<compile_context>
chip_gen: v5e
topology: v5e:2x2
jax: 0.10.0
libtpu: 0.0.40
codegen_flags: <defaults>
</compile_context>

<pallas_src>
import jax
import jax.numpy as jnp
from jax.experimental import pallas as pl
from jax.experimental.pallas import tpu as pltpu


def _mlp_adaln_kernel(x_ref, w1_ref, b1_ref, w2_ref, b2_ref, *out_refs):
    """One fused row tile of out = fc2(relu(fc1(x))), emitted as 6 chunks.

    fc1 is computed in f32 (it is tiny); fc2 is six per-chunk dots against
    static, 128-aligned lane slices of the resident W2/b2 tiles, each written
    directly to its output ref.  No [tb, 6*hd] temporary, no copy pass.
    """
    h = jnp.dot(x_ref[...], w1_ref[...], preferred_element_type=jnp.float32)
    h = jnp.maximum(h + b1_ref[...], 0.0)
    h = h.astype(w2_ref.dtype)            # one cast, reused by all six dots
    hd = out_refs[0].shape[-1]            # padded hidden_dim (multiple of 128)
    for c, o_ref in enumerate(out_refs):
        out_c = jnp.dot(h, w2_ref[:, c * hd:(c + 1) * hd],
                        preferred_element_type=jnp.float32)
        out_c = out_c + b2_ref[:, c * hd:(c + 1) * hd]
        o_ref[...] = out_c.astype(o_ref.dtype)


def prepare_mlp_adaln_params(w1, b1, w2, b2, hidden_dim, *,
                             w2_dtype=jnp.bfloat16):
    """One-time parameter prep (hoisted out of the per-call path).

    * Pads hidden_dim up to a multiple of 128 so every output store is
      lane-dense (no-op for the default hidden_dim=512).
    * Casts W2 -- the dominant HBM read at small batch -- to `w2_dtype`
      (bf16 default; per-channel int8 on v5e/v6e or fp8 on v7x would go here).
    * Keeps fc1 (W1, b1) and the biases in f32.
    Returns (params_dict, padded_hidden_dim).
    """
    H1 = w1.shape[1]
    assert w2.shape == (H1, 6 * hidden_dim)
    hd_pad = (-hidden_dim) % 128
    hd_p = hidden_dim + hd_pad
    if hd_pad:
        w2 = jnp.pad(w2.reshape(H1, 6, hidden_dim),
                     ((0, 0), (0, 0), (0, hd_pad))).reshape(H1, 6 * hd_p)
        b2 = jnp.pad(b2.reshape(6, hidden_dim),
                     ((0, 0), (0, hd_pad))).reshape(6 * hd_p)
    params = {
        "w1": w1.astype(jnp.float32),
        "b1": b1.reshape(1, H1).astype(jnp.float32),
        "w2": w2.astype(w2_dtype),
        "b2": b2.reshape(1, 6 * hd_p).astype(jnp.float32),
    }
    return params, hd_p


def mlp_adaln_forward(x, params, hidden_dim, hd_p, *, out_dtype=None):
    """x: [B, input_dim]; params from prepare_mlp_adaln_params.
    Returns a tuple of 6 arrays, each [B, hidden_dim] (== torch.chunk(out, 6, -1))."""
    B, input_dim = x.shape
    w1, b1, w2, b2 = params["w1"], params["b1"], params["w2"], params["b2"]
    H1 = w1.shape[1]
    N = 6 * hd_p
    out_dtype = x.dtype if out_dtype is None else out_dtype

    # Row tiling:
    #  * B <= 256: one fused grid step.  The call is weight-read dominated and
    #    a second tile / second TensorCore would just re-DMA W1/W2.
    #  * B  > 256: at least two 'parallel' row tiles (megacore-shardable on
    #    v7x), rows per tile capped at 512 so VMEM stays ~15 MiB even with
    #    f32 outputs -- safe on v7x's 64 MiB part (32 MiB scoped default).
    if B <= 256:
        tb = B
    else:
        tb = min(512, (((B + 1) // 2) + 7) // 8 * 8)
    grid = (pl.cdiv(B, tb),)

    flops = 2 * B * (input_dim * H1 + H1 * N)
    bytes_accessed = (x.size * x.dtype.itemsize
                      + w1.size * w1.dtype.itemsize
                      + w2.size * w2.dtype.itemsize
                      + b1.size * 4 + b2.size * 4
                      + B * N * jnp.dtype(out_dtype).itemsize)

    out_shape = tuple(jax.ShapeDtypeStruct((B, hd_p), out_dtype) for _ in range(6))
    out_specs = tuple(pl.BlockSpec((tb, hd_p), lambda i: (i, 0)) for _ in range(6))

    # W1/b1/W2/b2 have constant index_maps; their redundant double buffer
    # (~0.9 MiB, mostly W2) is well inside the VMEM budget at tb<=512, so we
    # keep default pipelining rather than overriding buffer counts.
    outs = pl.pallas_call(
        _mlp_adaln_kernel,
        out_shape=out_shape,
        grid_spec=pltpu.PrefetchScalarGridSpec(
            num_scalar_prefetch=0,
            grid=grid,
            in_specs=[
                pl.BlockSpec((tb, input_dim), lambda i: (i, 0)),   # x row tile
                pl.BlockSpec((input_dim, H1), lambda i: (0, 0)),   # W1 (whole)
                pl.BlockSpec((1, H1), lambda i: (0, 0)),           # b1
                pl.BlockSpec((H1, N), lambda i: (0, 0)),           # W2 (whole)
                pl.BlockSpec((1, N), lambda i: (0, 0)),            # b2
            ],
            out_specs=out_specs,
        ),
        compiler_params=pltpu.CompilerParams(
            dimension_semantics=("parallel",),       # independent row tiles
        ),
        cost_estimate=pl.CostEstimate(
            flops=flops, transcendentals=0, bytes_accessed=bytes_accessed),
    )(x, w1, b1, w2, b2)

    if hd_p != hidden_dim:
        # Consumers that can index the padded layout may skip this slice.
        outs = tuple(o[:, :hidden_dim] for o in outs)
    return outs


def mlp_adaln(x, w1, b1, w2, b2, hidden_dim, *, out_dtype=None,
              w2_dtype=jnp.bfloat16):
    """Convenience one-shot wrapper (prep + forward)."""
    params, hd_p = prepare_mlp_adaln_params(w1, b1, w2, b2, hidden_dim,
                                            w2_dtype=w2_dtype)
    return mlp_adaln_forward(x, params, hidden_dim, hd_p, out_dtype=out_dtype)


def _reference(x, w1, b1, w2, b2):
    h = jnp.maximum(x @ w1 + b1, 0.0)
    out = h @ w2 + b2
    return tuple(jnp.split(out, 6, axis=-1))


if __name__ == "__main__":
    # Module defaults: input_dim=256, hidden_dim=512.
    input_dim = 256
    hidden_dim = 512
    H1 = 128

    key = jax.random.PRNGKey(0)
    kx, k1, k2, k3, k4, kx2 = jax.random.split(key, 6)

    # PyTorch-style uniform(-1/sqrt(fan_in), +1/sqrt(fan_in)) init.
    bound1 = 1.0 / jnp.sqrt(jnp.float32(input_dim))
    w1 = jax.random.uniform(k1, (input_dim, H1), jnp.float32, -bound1, bound1)
    b1 = jax.random.uniform(k2, (H1,), jnp.float32, -bound1, bound1)
    bound2 = 1.0 / jnp.sqrt(jnp.float32(H1))
    w2 = jax.random.uniform(k3, (H1, 6 * hidden_dim), jnp.float32, -bound2, bound2)
    b2 = jax.random.uniform(k4, (6 * hidden_dim,), jnp.float32, -bound2, bound2)

    # One-time parameter prep (padding is a no-op for hidden_dim=512).
    params, hd_p = prepare_mlp_adaln_params(w1, b1, w2, b2, hidden_dim)

    # --- Small batch: single fused grid step -------------------------------
    B = 8
    x = jax.random.normal(kx, (B, input_dim), dtype=jnp.float32)
    chunks = jax.block_until_ready(mlp_adaln_forward(x, params, hidden_dim, hd_p))
    ref_chunks = _reference(x, w1, b1, w2, b2)
    for c, r in zip(chunks, ref_chunks):
        assert c.shape == (B, hidden_dim)
        # bf16 fc2 operands with f32 accumulation vs. pure-f32 reference.
        assert jnp.allclose(c, r, atol=2e-2, rtol=2e-2)

    # --- Multi-tile batch: 2 parallel row tiles, trailing tile partial ------
    B2 = 260
    x2 = jax.random.normal(kx2, (B2, input_dim), dtype=jnp.float32)
    chunks2 = jax.block_until_ready(mlp_adaln_forward(x2, params, hidden_dim, hd_p))
    ref_chunks2 = _reference(x2, w1, b1, w2, b2)
    for c, r in zip(chunks2, ref_chunks2):
        assert c.shape == (B2, hidden_dim)
        assert jnp.allclose(c, r, atol=2e-2, rtol=2e-2)

    print("KERNEL_OK")
</pallas_src>

<mosaic_0001>
module attributes {stable_mosaic.version = 11 : i64} {
  func.func @_mlp_adaln_kernel(%arg0: i32, %arg1: memref<8x256xf32, #tpu.memory_space<vmem>>, %arg2: memref<256x128xf32, #tpu.memory_space<vmem>>, %arg3: memref<1x128xf32, #tpu.memory_space<vmem>>, %arg4: memref<128x3072xbf16, #tpu.memory_space<vmem>>, %arg5: memref<1x3072xf32, #tpu.memory_space<vmem>>, %arg6: memref<8x512xf32, #tpu.memory_space<vmem>>, %arg7: memref<8x512xf32, #tpu.memory_space<vmem>>, %arg8: memref<8x512xf32, #tpu.memory_space<vmem>>, %arg9: memref<8x512xf32, #tpu.memory_space<vmem>>, %arg10: memref<8x512xf32, #tpu.memory_space<vmem>>, %arg11: memref<8x512xf32, #tpu.memory_space<vmem>>) attributes {dimension_semantics = [#tpu.dimension_semantics<parallel>], iteration_bounds = array<i64: 1>, scalar_prefetch = 0 : i64, scratch_operands = 0 : i64, tpu.core_type = #tpu.core_type<tc>, window_params = [{transform_indices = @transform_0, window_bounds = array<i64: 8, 256>}, {pipeline_mode = #tpu.pipeline_mode<synchronous>, transform_indices = @transform_1, window_bounds = array<i64: 256, 128>}, {pipeline_mode = #tpu.pipeline_mode<synchronous>, transform_indices = @transform_2, window_bounds = array<i64: 1, 128>}, {pipeline_mode = #tpu.pipeline_mode<synchronous>, transform_indices = @transform_3, window_bounds = array<i64: 128, 3072>}, {pipeline_mode = #tpu.pipeline_mode<synchronous>, transform_indices = @transform_4, window_bounds = array<i64: 1, 3072>}, {transform_indices = @transform_5, window_bounds = array<i64: 8, 512>}, {transform_indices = @transform_6, window_bounds = array<i64: 8, 512>}, {transform_indices = @transform_7, window_bounds = array<i64: 8, 512>}, {transform_indices = @transform_8, window_bounds = array<i64: 8, 512>}, {transform_indices = @transform_9, window_bounds = array<i64: 8, 512>}, {transform_indices = @transform_10, window_bounds = array<i64: 8, 512>}]} {
    %c0 = arith.constant 0 : index
    %c0_0 = arith.constant 0 : index
    %0 = vector.load %arg1[%c0, %c0_0] : memref<8x256xf32, #tpu.memory_space<vmem>>, vector<8x256xf32>
    %c0_1 = arith.constant 0 : index
    %c0_2 = arith.constant 0 : index
    %1 = vector.load %arg2[%c0_1, %c0_2] : memref<256x128xf32, #tpu.memory_space<vmem>>, vector<256x128xf32>
    %cst = arith.constant dense<0.000000e+00> : vector<8x128xf32>
    %2 = tpu.matmul %0, %1, %cst {dimension_numbers = #tpu.dot_dimension_numbers<[1], [0], [0], [1], [0, 0, 1, 1], [], []>} : vector<8x256xf32>, vector<256x128xf32>, vector<8x128xf32> -> vector<8x128xf32>
    %c0_3 = arith.constant 0 : index
    %c0_4 = arith.constant 0 : index
    %3 = vector.load %arg3[%c0_3, %c0_4] : memref<1x128xf32, #tpu.memory_space<vmem>>, vector<1x128xf32>
    %4 = vector.broadcast %3 : vector<1x128xf32> to vector<8x128xf32>
    %5 = arith.addf %2, %4 : vector<8x128xf32>
    %cst_5 = arith.constant 0.000000e+00 : f32
    %6 = vector.broadcast %cst_5 : f32 to vector<8x128xf32>
    %7 = arith.maximumf %5, %6 : vector<8x128xf32>
    %8 = arith.truncf %7 : vector<8x128xf32> to vector<8x128xbf16>
    %c0_6 = arith.constant 0 : index
    %c0_7 = arith.constant 0 : index
    %9 = vector.load %arg4[%c0_6, %c0_7] : memref<128x3072xbf16, #tpu.memory_space<vmem>>, vector<128x512xbf16>
    %cst_8 = arith.constant dense<0.000000e+00> : vector<8x512xf32>
    %10 = tpu.matmul %8, %9, %cst_8 {dimension_numbers = #tpu.dot_dimension_numbers<[1], [0], [0], [1], [0, 0, 1, 1], [], []>} : vector<8x128xbf16>, vector<128x512xbf16>, vector<8x512xf32> -> vector<8x512xf32>
    %c0_9 = arith.constant 0 : index
    %c0_10 = arith.constant 0 : index
    %11 = vector.load %arg5[%c0_9, %c0_10] : memref<1x3072xf32, #tpu.memory_space<vmem>>, vector<1x512xf32>
    %12 = vector.broadcast %11 : vector<1x512xf32> to vector<8x512xf32>
    %13 = arith.addf %10, %12 : vector<8x512xf32>
    %c0_11 = arith.constant 0 : index
    %c0_12 = arith.constant 0 : index
    %14 = vector.load %arg6[%c0_11, %c0_12] : memref<8x512xf32, #tpu.memory_space<vmem>>, vector<8x512xf32>
    tpu.vector_store %arg6[%c0_11, %c0_12], %13 {strides = array<i32>} : memref<8x512xf32, #tpu.memory_space<vmem>>, vector<8x512xf32>,
    %c0_13 = arith.constant 0 : index
    %c512 = arith.constant 512 : index
    %15 = vector.load %arg4[%c0_13, %c512] : memref<128x3072xbf16, #tpu.memory_space<vmem>>, vector<128x512xbf16>
    %cst_14 = arith.constant dense<0.000000e+00> : vector<8x512xf32>
    %16 = tpu.matmul %8, %15, %cst_14 {dimension_numbers = #tpu.dot_dimension_numbers<[1], [0], [0], [1], [0, 0, 1, 1], [], []>} : vector<8x128xbf16>, vector<128x512xbf16>, vector<8x512xf32> -> vector<8x512xf32>
    %c0_15 = arith.constant 0 : index
    %c512_16 = arith.constant 512 : index
    %17 = vector.load %arg5[%c0_15, %c512_16] : memref<1x3072xf32, #tpu.memory_space<vmem>>, vector<1x512xf32>
    %18 = vector.broadcast %17 : vector<1x512xf32> to vector<8x512xf32>
    %19 = arith.addf %16, %18 : vector<8x512xf32>
    %c0_17 = arith.constant 0 : index
    %c0_18 = arith.constant 0 : index
    %20 = vector.load %arg7[%c0_17, %c0_18] : memref<8x512xf32, #tpu.memory_space<vmem>>, vector<8x512xf32>
    tpu.vector_store %arg7[%c0_17, %c0_18], %19 {strides = array<i32>} : memref<8x512xf32, #tpu.memory_space<vmem>>, vector<8x512xf32>,
    %c0_19 = arith.constant 0 : index
    %c1024 = arith.constant 1024 : index
    %21 = vector.load %arg4[%c0_19, %c1024] : memref<128x3072xbf16, #tpu.memory_space<vmem>>, vector<128x512xbf16>
    %cst_20 = arith.constant dense<0.000000e+00> : vector<8x512xf32>
    %22 = tpu.matmul %8, %21, %cst_20 {dimension_numbers = #tpu.dot_dimension_numbers<[1], [0], [0], [1], [0, 0, 1, 1], [], []>} : vector<8x128xbf16>, vector<128x512xbf16>, vector<8x512xf32> -> vector<8x512xf32>
    %c0_21 = arith.constant 0 : index
    %c1024_22 = arith.constant 1024 : index
    %23 = vector.load %arg5[%c0_21, %c1024_22] : memref<1x3072xf32, #tpu.memory_space<vmem>>, vector<1x512xf32>
    %24 = vector.broadcast %23 : vector<1x512xf32> to vector<8x512xf32>
    %25 = arith.addf %22, %24 : vector<8x512xf32>
    %c0_23 = arith.constant 0 : index
    %c0_24 = arith.constant 0 : index
    %26 = vector.load %arg8[%c0_23, %c0_24] : memref<8x512xf32, #tpu.memory_space<vmem>>, vector<8x512xf32>
    tpu.vector_store %arg8[%c0_23, %c0_24], %25 {strides = array<i32>} : memref<8x512xf32, #tpu.memory_space<vmem>>, vector<8x512xf32>,
    %c0_25 = arith.constant 0 : index
    %c1536 = arith.constant 1536 : index
    %27 = vector.load %arg4[%c0_25, %c1536] : memref<128x3072xbf16, #tpu.memory_space<vmem>>, vector<128x512xbf16>
    %cst_26 = arith.constant dense<0.000000e+00> : vector<8x512xf32>
    %28 = tpu.matmul %8, %27, %cst_26 {dimension_numbers = #tpu.dot_dimension_numbers<[1], [0], [0], [1], [0, 0, 1, 1], [], []>} : vector<8x128xbf16>, vector<128x512xbf16>, vector<8x512xf32> -> vector<8x512xf32>
    %c0_27 = arith.constant 0 : index
    %c1536_28 = arith.constant 1536 : index
    %29 = vector.load %arg5[%c0_27, %c1536_28] : memref<1x3072xf32, #tpu.memory_space<vmem>>, vector<1x512xf32>
    %30 = vector.broadcast %29 : vector<1x512xf32> to vector<8x512xf32>
    %31 = arith.addf %28, %30 : vector<8x512xf32>
    %c0_29 = arith.constant 0 : index
    %c0_30 = arith.constant 0 : index
    %32 = vector.load %arg9[%c0_29, %c0_30] : memref<8x512xf32, #tpu.memory_space<vmem>>, vector<8x512xf32>
    tpu.vector_store %arg9[%c0_29, %c0_30], %31 {strides = array<i32>} : memref<8x512xf32, #tpu.memory_space<vmem>>, vector<8x512xf32>,
    %c0_31 = arith.constant 0 : index
    %c2048 = arith.constant 2048 : index
    %33 = vector.load %arg4[%c0_31, %c2048] : memref<128x3072xbf16, #tpu.memory_space<vmem>>, vector<128x512xbf16>
    %cst_32 = arith.constant dense<0.000000e+00> : vector<8x512xf32>
    %34 = tpu.matmul %8, %33, %cst_32 {dimension_numbers = #tpu.dot_dimension_numbers<[1], [0], [0], [1], [0, 0, 1, 1], [], []>} : vector<8x128xbf16>, vector<128x512xbf16>, vector<8x512xf32> -> vector<8x512xf32>
    %c0_33 = arith.constant 0 : index
    %c2048_34 = arith.constant 2048 : index
    %35 = vector.load %arg5[%c0_33, %c2048_34] : memref<1x3072xf32, #tpu.memory_space<vmem>>, vector<1x512xf32>
    %36 = vector.broadcast %35 : vector<1x512xf32> to vector<8x512xf32>
    %37 = arith.addf %34, %36 : vector<8x512xf32>
    %c0_35 = arith.constant 0 : index
    %c0_36 = arith.constant 0 : index
    %38 = vector.load %arg10[%c0_35, %c0_36] : memref<8x512xf32, #tpu.memory_space<vmem>>, vector<8x512xf32>
    tpu.vector_store %arg10[%c0_35, %c0_36], %37 {strides = array<i32>} : memref<8x512xf32, #tpu.memory_space<vmem>>, vector<8x512xf32>,
    %c0_37 = arith.constant 0 : index
    %c2560 = arith.constant 2560 : index
    %39 = vector.load %arg4[%c0_37, %c2560] : memref<128x3072xbf16, #tpu.memory_space<vmem>>, vector<128x512xbf16>
    %cst_38 = arith.constant dense<0.000000e+00> : vector<8x512xf32>
    %40 = tpu.matmul %8, %39, %cst_38 {dimension_numbers = #tpu.dot_dimension_numbers<[1], [0], [0], [1], [0, 0, 1, 1], [], []>} : vector<8x128xbf16>, vector<128x512xbf16>, vector<8x512xf32> -> vector<8x512xf32>
    %c0_39 = arith.constant 0 : index
    %c2560_40 = arith.constant 2560 : index
    %41 = vector.load %arg5[%c0_39, %c2560_40] : memref<1x3072xf32, #tpu.memory_space<vmem>>, vector<1x512xf32>
    %42 = vector.broadcast %41 : vector<1x512xf32> to vector<8x512xf32>
    %43 = arith.addf %40, %42 : vector<8x512xf32>
    %c0_41 = arith.constant 0 : index
    %c0_42 = arith.constant 0 : index
    %44 = vector.load %arg11[%c0_41, %c0_42] : memref<8x512xf32, #tpu.memory_space<vmem>>, vector<8x512xf32>
    tpu.vector_store %arg11[%c0_41, %c0_42], %43 {strides = array<i32>} : memref<8x512xf32, #tpu.memory_space<vmem>>, vector<8x512xf32>,
    return
  }
  func.func @transform_0(%arg0: i32) -> (i32, i32) {
    %c0_i32 = arith.constant 0 : i32
    %c0_i32_0 = arith.constant 0 : i32
    return %arg0, %c0_i32 : i32, i32
  }
  func.func @transform_1(%arg0: i32) -> (i32, i32) {
    %c0_i32 = arith.constant 0 : i32
    %c0_i32_0 = arith.constant 0 : i32
    %c0_i32_1 = arith.constant 0 : i32
    return %c0_i32, %c0_i32_0 : i32, i32
  }
  func.func @transform_2(%arg0: i32) -> (i32, i32) {
    %c0_i32 = arith.constant 0 : i32
    %c0_i32_0 = arith.constant 0 : i32
    %c0_i32_1 = arith.constant 0 : i32
    return %c0_i32, %c0_i32_0 : i32, i32
  }
  func.func @transform_3(%arg0: i32) -> (i32, i32) {
    %c0_i32 = arith.constant 0 : i32
    %c0_i32_0 = arith.constant 0 : i32
    %c0_i32_1 = arith.constant 0 : i32
    return %c0_i32, %c0_i32_0 : i32, i32
  }
  func.func @transform_4(%arg0: i32) -> (i32, i32) {
    %c0_i32 = arith.constant 0 : i32
    %c0_i32_0 = arith.constant 0 : i32
    %c0_i32_1 = arith.constant 0 : i32
    return %c0_i32, %c0_i32_0 : i32, i32
  }
  func.func @transform_5(%arg0: i32) -> (i32, i32) {
    %c0_i32 = arith.constant 0 : i32
    %c0_i32_0 = arith.constant 0 : i32
    return %arg0, %c0_i32 : i32, i32
  }
  func.func @transform_6(%arg0: i32) -> (i32, i32) {
    %c0_i32 = arith.constant 0 : i32
    %c0_i32_0 = arith.constant 0 : i32
    return %arg0, %c0_i32 : i32, i32
  }
  func.func @transform_7(%arg0: i32) -> (i32, i32) {
    %c0_i32 = arith.constant 0 : i32
    %c0_i32_0 = arith.constant 0 : i32
    return %arg0, %c0_i32 : i32, i32
  }
  func.func @transform_8(%arg0: i32) -> (i32, i32) {
    %c0_i32 = arith.constant 0 : i32
    %c0_i32_0 = arith.constant 0 : i32
    return %arg0, %c0_i32 : i32, i32
  }
  func.func @transform_9(%arg0: i32) -> (i32, i32) {
    %c0_i32 = arith.constant 0 : i32
    %c0_i32_0 = arith.constant 0 : i32
    return %arg0, %c0_i32 : i32, i32
  }
  func.func @transform_10(%arg0: i32) -> (i32, i32) {
    %c0_i32 = arith.constant 0 : i32
    %c0_i32_0 = arith.constant 0 : i32
    return %arg0, %c0_i32 : i32, i32
  }
}

</mosaic_0001>

<bundles_post_ra>
// kernel: tpu_custom_call.1
= control target key start
LH: loop header
LB: loop body
LE: loop exit
PB: predicated region body
PF: predicated region fallthrough
CT: control target
= control target key end

     0   :  { %16 = vsyncpa [#allocation3], 0  ;;  %s3171_s0 = inlined_call_operand.hbm [shape: f32[8,256], index: 0, kind: input, shape index: {}]   ;;  %s3172_s1 = inlined_call_operand.hbm [shape: f32[256,128], index: 1, kind: input, shape index: {}]   ;;  %s3173_s2 = inlined_call_operand.vmem [shape: f32[1,128], index: 2, kind: input, shape index: {}]   ;;  %s3174_s3 = inlined_call_operand.hbm [shape: bf16[128,3072], index: 3, kind: input, shape index: {}]   ;;  %s3175_s4 = inlined_call_operand.hbm [shape: f32[1,3072], index: 4, kind: input, shape index: {}]   ;;  %s3176_s5 = inlined_call_operand.hbm [shape: f32[8,512], index: 5, kind: output, shape index: {0}]   ;;  %s3177_s6 = inlined_call_operand.hbm [shape: f32[8,512], index: 6, kind: output, shape index: {1}]   ;;  %s3178_s7 = inlined_call_operand.hbm [shape: f32[8,512], index: 7, kind: output, shape index: {2}]   ;;  %s3179_s8 = inlined_call_operand.hbm [shape: f32[8,512], index: 8, kind: output, shape index: {3}]   ;;  %s3180_s9 = inlined_call_operand.hbm [shape: f32[8,512], index: 9, kind: output, shape index: {4}]   ;;  %s3181_s10 = inlined_call_operand.hbm [shape: f32[8,512], index: 10, kind: output, shape index: {5}]  }
   0x1   :  { %17 = vsyncpa [#allocation6], 0 }
   0x2   :  { %18 = vsyncpa [#allocation9], 0 }
   0x3   :  { %19 = vsyncpa [#allocation4], 0 }
   0x4   :  { %20 = vsyncpa [#allocation12], 0 }
   0x5   :  { %21 = vsyncpa [#allocation15], 0  ;;  %s38_s15 = sshll.u32 %s3172_s1, 4  ;;  %s39_s15 = int_to_ptr.hbm [resolvable:$true] %s38_s15 }
   0x6   :  { %22 = vsyncpa [#allocation18], 0  ;;  %s3043_s16 = smov [#allocation5]   ;;  %s28_s20 = sshll.u32 %s3171_s0, 4  ;;  %s29_s20 = int_to_ptr.hbm [resolvable:$true] %s28_s20 }
   0x7   :  { %s40_s17 = sshll.u32 %s3043_s16, 4  ;;  %s3044_s21 = smov 128   ;;  %s41_s17 = int_to_ptr.vmem [resolvable:$true] %s40_s17 }
   0x8   :  { %s3045_s22 = smov 8   ;;  %s3046_s23 = smov [#allocation2]  }
   0x9   :  { %46 = dma.hbm_to_vmem [thread:$0]  %s39_s15, 4096, %s41_s17, [#allocation6], %s3044_s21, %s3044_s21, %s3045_s22  }
   0xa   :  { %s30_s24 = sshll.u32 %s3046_s23, 4  ;;  %s53_s27 = sshll.u32 %s3174_s3, 4  ;;  %s31_s24 = int_to_ptr.vmem [resolvable:$true] %s30_s24  ;;  %s54_s27 = int_to_ptr.hbm [resolvable:$true] %s53_s27 }
   0xb   :  { %33 = dma.hbm_to_vmem [thread:$0]  %s29_s20, 256, %s31_s24, [#allocation3]  }
   0xc   :  { %s3047_s1 = smov [#allocation7]   ;;  %s67_s0 = sshll.u32 %s3175_s4, 4  ;;  %s68_s0 = int_to_ptr.hbm [resolvable:$true] %s67_s0 }
   0xd   :  { %s55_s28 = sshll.u32 %s3047_s1, 4  ;;  %s3048_s11 = smov 1536   ;;  %s56_s28 = int_to_ptr.vmem [resolvable:$true] %s55_s28 }
   0xe   :  { %s3049_s12 = smov 96   ;;  %s3050_s13 = smov [#allocation8]  }
   0xf   :  { %61 = dma.hbm_to_vmem [thread:$0]  %s54_s27, 24576, %s56_s28, [#allocation6], %s3048_s11, %s3048_s11, %s3049_s12  }
  0x10   :  { %s69_s14 = sshll.u32 %s3050_s13, 4  ;;  %s70_s14 = int_to_ptr.vmem [resolvable:$true] %s69_s14 }
  0x11   :  { %72 = dma.hbm_to_vmem [thread:$0]  %s68_s0, 384, %s70_s14, [#allocation9]  }
  0x12   :  { %3029 = dma.done.wait [#allocation3], 256  }
  0x13   :  { %3030 = vsyncadd [#allocation3], 4294967040 }
  0x14   :  { %3031 = dma.done.wait [#allocation6], 28672  }
  0x15   :  { %3032 = vsyncadd [#allocation6], 4294938624 }
  0x16   :  { %3033 = dma.done.wait [#allocation9], 384  }
  0x17   :  { %3034 = vsyncadd [#allocation9], 4294966912  ;;  %v106_v0 = vld [vmem:[#allocation5 + $0x78] sm:$0xff]  ;;  %v105_v1 = vld [vmem:[#allocation5 + $0x70] sm:$0xff]  ;;  %s1724_s16 = sshll.u32 %s3176_s5, 4  ;;  %s3051_s17 = smov [#allocation10]   ;;  %s1725_s16 = int_to_ptr.hbm [resolvable:$true] %s1724_s16 }
  0x18   :  { %v122_v2 = vld [vmem:[#allocation5 + $0xf8] sm:$0xff]  ;;  %127 = vmatpush.msra.mxu0 %v106_v0  ;;  %v121_v3 = vld [vmem:[#allocation5 + $0xf0] sm:$0xff]  ;;  %v104_v4 = vld [vmem:[#allocation5 + $0x68] sm:$0xff]  ;;  %s1722_s18 = sshll.u32 %s3051_s17, 4  ;;  %s3052_s19 = smov [#allocation11]   ;;  %s1723_s18 = int_to_ptr.vmem [resolvable:$true] %s1722_s18 }
  0x19   :  { %147 = vmatpush.msra.mxu1 %v122_v2  ;;  %v120_v5 = vld [vmem:[#allocation5 + $0xe8] sm:$0xff]  ;;  %v103_v6 = vld [vmem:[#allocation5 + $0x60] sm:$0xff]  ;;  %v102_v8 = vld [vmem:[#allocation5 + $0x58] sm:$0xff]  ;;  %s1733_s5 = sshll.u32 %s3052_s19, 4  ;;  %s1735_s22 = sshll.u32 %s3177_s6, 4  ;;  %s1734_s5 = int_to_ptr.vmem [resolvable:$true] %s1733_s5  ;;  %s1736_s22 = int_to_ptr.hbm [resolvable:$true] %s1735_s22 }
  0x1a   :  { %128 = vmatpush.msra.mxu0 %v105_v1  ;;  %v119_v7 = vld [vmem:[#allocation5 + $0xe0] sm:$0xff]  ;;  %v118_v9 = vld [vmem:[#allocation5 + $0xd8] sm:$0xff]  ;;  %v101_v10 = vld [vmem:[#allocation5 + $0x50] sm:$0xff]  ;;  %s3053_s6 = smov [#allocation13]   ;;  %s1746_s26 = sshll.u32 %s3178_s7, 4  ;;  %s1747_s26 = int_to_ptr.hbm [resolvable:$true] %s1746_s26 }
  0x1b   :  { %148 = vmatpush.msra.mxu1 %v121_v3  ;;  %v117_v11 = vld [vmem:[#allocation5 + $0xd0] sm:$0xff]  ;;  %v100_v12 = vld [vmem:[#allocation5 + $0x48] sm:$0xff]  ;;  %v99_v14 = vld [vmem:[#allocation5 + $0x40] sm:$0xff]  ;;  %s1744_s23 = sshll.u32 %s3053_s6, 4  ;;  %s3054_s7 = smov [#allocation14]   ;;  %s1745_s23 = int_to_ptr.vmem [resolvable:$true] %s1744_s23 }
  0x1c   :  { %129 = vmatpush.msra.mxu0 %v104_v4  ;;  %v116_v13 = vld [vmem:[#allocation5 + $0xc8] sm:$0xff]  ;;  %v1928_v15 = vld [vmem:[#allocation7 + $0x540] sm:$0xf]  ;;  %v2610_v19 = vld [vmem:[#allocation7 + $0x544] sm:$0xf]  ;;  %s1755_s27 = sshll.u32 %s3054_s7, 4  ;;  %s1756_s27 = int_to_ptr.vmem [resolvable:$true] %s1755_s27 }
  0x1d   :  { %149 = vmatpush.msra.mxu1 %v120_v5  ;;  %v2612_v16 = vld [vmem:[#allocation7 + $0x59c] sm:$0xf0]  ;;  %v1930_v20 = vld [vmem:[#allocation7 + $0x5a0] sm:$0xf0]  ;;  %v98_v21 = vld [vmem:[#allocation5 + $0x38] sm:$0xff]  ;;  %s1757_s29 = sshll.u32 %s3179_s8, 4  ;;  %s1758_s29 = int_to_ptr.hbm [resolvable:$true] %s1757_s29 }
  0x1e   :  { %130 = vmatpush.msra.mxu0 %v103_v6  ;;  %v115_v17 = vld [vmem:[#allocation5 + $0xc0] sm:$0xff]  ;;  %v1929_v18 = vor.u32 %v2612_v16, %v1928_v15  ;;  %v114_v22 = vld [vmem:[#allocation5 + $0xb8] sm:$0xff]  ;;  %v1933_v23 = vor.u32 %v2610_v19, %v1930_v20  ;;  %v97_v29 = vld [vmem:[#allocation5 + $0x30] sm:$0xff]  ;;  %s3055_s8 = smov [#allocation16]   ;;  %s1768_s12 = sshll.u32 %s3180_s9, 4  ;;  %s1769_s12 = int_to_ptr.hbm [resolvable:$true] %s1768_s12 }
  0x1f   :  { %150 = vmatpush.msra.mxu1 %v119_v7  ;;  %v1912_v24 = vld [vmem:[#allocation7 + $0x480] sm:$0xf]  ;;  %v2606_v26 = vld [vmem:[#allocation7 + $0x484] sm:$0xf]  ;;  %v113_v30 = vld [vmem:[#allocation5 + $0xb0] sm:$0xff]  ;;  %s1766_s30 = sshll.u32 %s3055_s8, 4  ;;  %s1767_s30 = int_to_ptr.vmem [resolvable:$true] %s1766_s30 }
  0x20   :  { %131 = vmatpush.msra.mxu0 %v102_v8  ;;  %371 = vmatpush.bf16.msra.mxu2 %v1929_v18  ;;  %v2608_v25 = vld [vmem:[#allocation7 + $0x4dc] sm:$0xf0]  ;;  %v1914_v28 = vld [vmem:[#allocation7 + $0x4e0] sm:$0xf0]  ;;  %v96_v36 = vld [vmem:[#allocation5 + $0x28] sm:$0xff]  ;;  %s3056_s9 = smov [#allocation17]  }
  0x21   :  { %151 = vmatpush.msra.mxu1 %v118_v9  ;;  %v1913_v27 = vor.u32 %v2608_v25, %v1912_v24  ;;  %384 = vmatpush.bf16.msra.mxu3 %v1933_v23  ;;  %v1917_v31 = vor.u32 %v2606_v26, %v1914_v28  ;;  %v1896_v32 = vld [vmem:[#allocation7 + $0x3c0] sm:$0xf]  ;;  %v2602_v34 = vld [vmem:[#allocation7 + $0x3c4] sm:$0xf]  ;;  %v112_v37 = vld [vmem:[#allocation5 + $0xa8] sm:$0xff]  ;;  %s1777_s13 = sshll.u32 %s3056_s9, 4  ;;  %s1778_s13 = int_to_ptr.vmem [resolvable:$true] %s1777_s13 }
  0x22   :  { %132 = vmatpush.msra.mxu0 %v101_v10  ;;  %v2604_v33 = vld [vmem:[#allocation7 + $0x41c] sm:$0xf0]  ;;  %v1898_v35 = vld [vmem:[#allocation7 + $0x420] sm:$0xf0]  ;;  %v94_v46 = vld [vmem:[#allocation5 + $0x18] sm:$0xff]  ;;  %s1779_s4 = sshll.u32 %s3181_s10, 4  ;;  %s1780_s4 = int_to_ptr.hbm [resolvable:$true] %s1779_s4 }
  0x23   :  { %152 = vmatpush.msra.mxu1 %v117_v11  ;;  %v1897_v38 = vor.u32 %v2604_v33, %v1896_v32  ;;  %v1880_v39 = vld [vmem:[#allocation7 + $0x300] sm:$0xf]  ;;  %v1901_v43 = vor.u32 %v2602_v34, %v1898_v35  ;;  %v2598_v44 = vld [vmem:[#allocation7 + $0x304] sm:$0xf]  ;;  %v110_v47 = vld [vmem:[#allocation5 + $0x98] sm:$0xff] }
  0x24   :  { %133 = vmatpush.msra.mxu0 %v100_v12  ;;  %372 = vmatpush.bf16.msra.mxu2 %v1913_v27  ;;  %v2600_v40 = vld [vmem:[#allocation7 + $0x35c] sm:$0xf0]  ;;  %v1882_v45 = vld [vmem:[#allocation7 + $0x360] sm:$0xf0]  ;;  %v93_v51 = vld [vmem:[#allocation5 + $0x10] sm:$0xff] }
  0x25   :  { %153 = vmatpush.msra.mxu1 %v116_v13  ;;  %v95_v41 = vld [vmem:[#allocation5 + $0x20] sm:$0xff]  ;;  %385 = vmatpush.bf16.msra.mxu3 %v1917_v31  ;;  %v1881_v48 = vor.u32 %v2600_v40, %v1880_v39  ;;  %v92_v52 = vld [vmem:[#allocation5 + $0x8] sm:$0xff]  ;;  %v109_v53 = vld [vmem:[#allocation5 + $0x90] sm:$0xff]  ;;  %v1885_v54 = vor.u32 %v2598_v44, %v1882_v45 }
  0x26   :  { %134 = vmatpush.msra.mxu0 %v99_v14  ;;  %v111_v42 = vld [vmem:[#allocation5 + $0xa0] sm:$0xff]  ;;  %v108_v55 = vld [vmem:[#allocation5 + $0x88] sm:$0xff]  ;;  %v89_v2 = vld [vmem:[#allocation2] sm:$0xff] }
  0x27   :  { %154 = vmatpush.msra.mxu1 %v115_v17  ;;  %v1864_v49 = vld [vmem:[#allocation7 + $0x240] sm:$0xf]  ;;  %v1936_v56 = vld [vmem:[#allocation7 + $0x548] sm:$0xf]  ;;  %v2611_v58 = vld [vmem:[#allocation7 + $0x54c] sm:$0xf] }
  0x28   :  { %135 = vmatpush.msra.mxu0 %v98_v21  ;;  %373 = vmatpush.bf16.msra.mxu2 %v1897_v38  ;;  %v2596_v50 = vld [vmem:[#allocation7 + $0x29c] sm:$0xf0]  ;;  %v2613_v57 = vld [vmem:[#allocation7 + $0x5a4] sm:$0xf0]  ;;  %v1938_v59 = vld [vmem:[#allocation7 + $0x5a8] sm:$0xf0] }
  0x29   :  { %155 = vmatpush.msra.mxu1 %v114_v22  ;;  %386 = vmatpush.bf16.msra.mxu3 %v1901_v43  ;;  %v1865_v60 = vor.u32 %v2596_v50, %v1864_v49  ;;  %v2594_v61 = vld [vmem:[#allocation7 + $0x244] sm:$0xf]  ;;  %v1848_v63 = vld [vmem:[#allocation7 + $0x180] sm:$0xf]  ;;  %v90_v4 = vld [vmem:[#allocation2 + $0x8] sm:$0xff]  ;;  %v1937_v5 = vor.u32 %v2613_v57, %v1936_v56  ;;  %v1941_v6 = vor.u32 %v2611_v58, %v1938_v59 }
  0x2a   :  { %136 = vmatpush.msra.mxu0 %v97_v29  ;;  %v1866_v62 = vld [vmem:[#allocation7 + $0x2a0] sm:$0xf0]  ;;  %v2592_v0 = vld [vmem:[#allocation7 + $0x1dc] sm:$0xf0]  ;;  %v1920_v7 = vld [vmem:[#allocation7 + $0x488] sm:$0xf] }
  0x2b   :  { %156 = vmatpush.msra.mxu1 %v113_v30  ;;  %v91_v1 = vld [vmem:[#allocation5] sm:$0xff]  ;;  %v2609_v8 = vld [vmem:[#allocation7 + $0x4e4] sm:$0xf0]  ;;  %v2607_v9 = vld [vmem:[#allocation7 + $0x48c] sm:$0xf]  ;;  %v1869_v11 = vor.u32 %v2594_v61, %v1866_v62  ;;  %v1849_v12 = vor.u32 %v2592_v0, %v1848_v63 }
  0x2c   :  { %137 = vmatpush.msra.mxu0 %v96_v36  ;;  %374 = vmatpush.bf16.msra.mxu2 %v1881_v48  ;;  %v107_v3 = vld [vmem:[#allocation5 + $0x80] sm:$0xff]  ;;  %v1922_v10 = vld [vmem:[#allocation7 + $0x4e8] sm:$0xf0]  ;;  %v1921_v17 = vor.u32 %v2609_v8, %v1920_v7  ;;  %v1904_v19 = vld [vmem:[#allocation7 + $0x3c8] sm:$0xf] }
  0x2d   :  { %157 = vmatpush.msra.mxu1 %v112_v37  ;;  %387 = vmatpush.bf16.msra.mxu3 %v1885_v54  ;;  %v2590_v13 = vld [vmem:[#allocation7 + $0x184] sm:$0xf]  ;;  %v1832_v15 = vld [vmem:[#allocation7 + $0xc0] sm:$0xf]  ;;  %v1925_v18 = vor.u32 %v2607_v9, %v1922_v10  ;;  %v2605_v20 = vld [vmem:[#allocation7 + $0x424] sm:$0xf0] }
  0x2e   :  { %138 = vmatpush.msra.mxu0 %v95_v41  ;;  %v1850_v14 = vld [vmem:[#allocation7 + $0x1e0] sm:$0xf0]  ;;  %v2588_v16 = vld [vmem:[#allocation7 + $0x11c] sm:$0xf0]  ;;  %v2603_v21 = vld [vmem:[#allocation7 + $0x3cc] sm:$0xf]  ;;  %v1905_v31 = vor.u32 %v2605_v20, %v1904_v19 }
  0x2f   :  { %158 = vmatpush.msra.mxu1 %v111_v42  ;;  %v1906_v22 = vld [vmem:[#allocation7 + $0x428] sm:$0xf0]  ;;  %v1853_v23 = vor.u32 %v2590_v13, %v1850_v14  ;;  %v1833_v24 = vor.u32 %v2588_v16, %v1832_v15  ;;  %v2586_v25 = vld [vmem:[#allocation7 + $0xc4] sm:$0xf]  ;;  %v1816_v27 = vld [vmem:[#allocation7] sm:$0xf] }
  0x30   :  { %139 = vmatpush.msra.mxu0 %v94_v46  ;;  %375 = vmatpush.bf16.msra.mxu2 %v1865_v60  ;;  %v1834_v26 = vld [vmem:[#allocation7 + $0x120] sm:$0xf0]  ;;  %v2584_v28 = vld [vmem:[#allocation7 + $0x5c] sm:$0xf0]  ;;  %v2056_v29 = vld [vmem:[#allocation7 + $0x550] sm:$0xf]  ;;  %v1909_v32 = vor.u32 %v2603_v21, %v1906_v22 }
  0x31   :  { %159 = vmatpush.msra.mxu1 %v110_v47  ;;  %388 = vmatpush.bf16.msra.mxu3 %v1869_v11  ;;  %v2644_v30 = vld [vmem:[#allocation7 + $0x5ac] sm:$0xf0]  ;;  %v1888_v33 = vld [vmem:[#allocation7 + $0x308] sm:$0xf]  ;;  %v2599_v35 = vld [vmem:[#allocation7 + $0x30c] sm:$0xf]  ;;  %v1837_v37 = vor.u32 %v2586_v25, %v1834_v26  ;;  %v1817_v38 = vor.u32 %v2584_v28, %v1816_v27 }
  0x32   :  { %140 = vmatpush.msra.mxu0 %v93_v51  ;;  %v2601_v34 = vld [vmem:[#allocation7 + $0x364] sm:$0xf0]  ;;  %v1890_v36 = vld [vmem:[#allocation7 + $0x368] sm:$0xf0]  ;;  %v2582_v39 = vld [vmem:[#allocation7 + $0x4] sm:$0xf]  ;;  %v2057_v41 = vor.u32 %v2644_v30, %v2056_v29 }
  0x33   :  { %160 = vmatpush.msra.mxu1 %v109_v53  ;;  %v1818_v40 = vld [vmem:[#allocation7 + $0x60] sm:$0xf0]  ;;  %v2642_v42 = vld [vmem:[#allocation7 + $0x554] sm:$0xf]  ;;  %v2040_v44 = vld [vmem:[#allocation7 + $0x490] sm:$0xf]  ;;  %v1889_v46 = vor.u32 %v2601_v34, %v1888_v33  ;;  %v1893_v47 = vor.u32 %v2599_v35, %v1890_v36 }
  0x34   :  { %141 = vmatpush.msra.mxu0 %v92_v52  ;;  %376 = vmatpush.bf16.msra.mxu2 %v1849_v12  ;;  %v2058_v43 = vld [vmem:[#allocation7 + $0x5b0] sm:$0xf0]  ;;  %v2640_v45 = vld [vmem:[#allocation7 + $0x4ec] sm:$0xf0]  ;;  %v1872_v48 = vld [vmem:[#allocation7 + $0x248] sm:$0xf]  ;;  %v1821_v52 = vor.u32 %v2582_v39, %v1818_v40 }
  0x35   :  { %161 = vmatpush.msra.mxu1 %v108_v55  ;;  %389 = vmatpush.bf16.msra.mxu3 %v1853_v23  ;;  %v2597_v49 = vld [vmem:[#allocation7 + $0x2a4] sm:$0xf0]  ;;  %v2595_v50 = vld [vmem:[#allocation7 + $0x24c] sm:$0xf]  ;;  %v2061_v53 = vor.u32 %v2642_v42, %v2058_v43  ;;  %v2041_v54 = vor.u32 %v2640_v45, %v2040_v44  ;;  %v2638_v55 = vld [vmem:[#allocation7 + $0x494] sm:$0xf] }
  0x36   :  { %142 = vmatpush.msra.mxu0 %v91_v1  ;;  %v1874_v51 = vld [vmem:[#allocation7 + $0x2a8] sm:$0xf0]  ;;  %v2042_v56 = vld [vmem:[#allocation7 + $0x4f0] sm:$0xf0]  ;;  %v2024_v57 = vld [vmem:[#allocation7 + $0x3d0] sm:$0xf]  ;;  %v1873_v59 = vor.u32 %v2597_v49, %v1872_v48 }
  0x37   :  { %162 = vmatpush.msra.mxu1 %v107_v3  ;;  %143 = vmatmul.f32.vlgmr.msra.gmra.mxu0 %v89_v2  ;;  %v2636_v58 = vld [vmem:[#allocation7 + $0x42c] sm:$0xf0]  ;;  %v1877_v60 = vor.u32 %v2595_v50, %v1874_v51  ;;  %v1856_v61 = vld [vmem:[#allocation7 + $0x188] sm:$0xf]  ;;  %v2591_v63 = vld [vmem:[#allocation7 + $0x18c] sm:$0xf]  ;;  %v2045_v1 = vor.u32 %v2638_v55, %v2042_v56 }
  0x38   :  { %163 = vmatmul.f32.vlgmr.msra.gmra.mxu1 %v90_v4  ;;  %397 = vmatpush.bf16.msrb.mxu0 %v1937_v5  ;;  %v2593_v62 = vld [vmem:[#allocation7 + $0x1e4] sm:$0xf0]  ;;  %v1858_v0 = vld [vmem:[#allocation7 + $0x1e8] sm:$0xf0]  ;;  %v2025_v2 = vor.u32 %v2636_v58, %v2024_v57  ;;  %v2634_v3 = vld [vmem:[#allocation7 + $0x3d4] sm:$0xf] }
  0x39   :  { %410 = vmatpush.bf16.msrb.mxu1 %v1941_v6  ;;  %377 = vmatpush.bf16.msra.mxu2 %v1833_v24  ;;  %v2026_v4 = vld [vmem:[#allocation7 + $0x430] sm:$0xf0]  ;;  %v2008_v5 = vld [vmem:[#allocation7 + $0x310] sm:$0xf]  ;;  %v1857_v7 = vor.u32 %v2593_v62, %v1856_v61  ;;  %v1861_v8 = vor.u32 %v2591_v63, %v1858_v0  ;;  %v1840_v9 = vld [vmem:[#allocation7 + $0xc8] sm:$0xf] }
  0x3a   :  { %390 = vmatpush.bf16.msra.mxu3 %v1837_v37  ;;  %v2632_v6 = vld [vmem:[#allocation7 + $0x36c] sm:$0xf0]  ;;  %v2589_v10 = vld [vmem:[#allocation7 + $0x124] sm:$0xf0]  ;;  %v2587_v11 = vld [vmem:[#allocation7 + $0xcc] sm:$0xf]  ;;  %v2029_v13 = vor.u32 %v2634_v3, %v2026_v4 }
  0x3b   :  { %v1842_v12 = vld [vmem:[#allocation7 + $0x128] sm:$0xf0]  ;;  %v2009_v14 = vor.u32 %v2632_v6, %v2008_v5  ;;  %v2630_v15 = vld [vmem:[#allocation7 + $0x314] sm:$0xf]  ;;  %v1841_v19 = vor.u32 %v2589_v10, %v1840_v9  ;;  %v1824_v21 = vld [vmem:[#allocation7 + $0x8] sm:$0xf] }
  0x3c   :  { %398 = vmatpush.bf16.msrb.mxu0 %v1921_v17  ;;  %v2010_v16 = vld [vmem:[#allocation7 + $0x370] sm:$0xf0]  ;;  %v1992_v17 = vld [vmem:[#allocation7 + $0x250] sm:$0xf]  ;;  %v1845_v20 = vor.u32 %v2587_v11, %v1842_v12  ;;  %v2585_v22 = vld [vmem:[#allocation7 + $0x64] sm:$0xf0] }
  0x3d   :  { %411 = vmatpush.bf16.msrb.mxu1 %v1925_v18  ;;  %378 = vmatpush.bf16.msra.mxu2 %v1817_v38  ;;  %v2628_v18 = vld [vmem:[#allocation7 + $0x2ac] sm:$0xf0]  ;;  %v2583_v23 = vld [vmem:[#allocation7 + $0xc] sm:$0xf]  ;;  %v2064_v25 = vld [vmem:[#allocation7 + $0x558] sm:$0xf]  ;;  %v2013_v29 = vor.u32 %v2630_v15, %v2010_v16  ;;  %v1825_v33 = vor.u32 %v2585_v22, %v1824_v21 }
  0x3e   :  { %391 = vmatpush.bf16.msra.mxu3 %v1821_v52  ;;  %v1826_v24 = vld [vmem:[#allocation7 + $0x68] sm:$0xf0]  ;;  %v2645_v26 = vld [vmem:[#allocation7 + $0x5b4] sm:$0xf0]  ;;  %v2643_v27 = vld [vmem:[#allocation7 + $0x55c] sm:$0xf]  ;;  %v1993_v30 = vor.u32 %v2628_v18, %v1992_v17 }
  0x3f   :  { %v2066_v28 = vld [vmem:[#allocation7 + $0x5b8] sm:$0xf0]  ;;  %v1829_v34 = vor.u32 %v2583_v23, %v1826_v24  ;;  %v2065_v35 = vor.u32 %v2645_v26, %v2064_v25  ;;  %v2048_v37 = vld [vmem:[#allocation7 + $0x498] sm:$0xf]  ;;  %v1976_v62 = vld [vmem:[#allocation7 + $0x190] sm:$0xf] }
  0x40   :  { %399 = vmatpush.bf16.msrb.mxu0 %v1905_v31  ;;  %v2626_v31 = vld [vmem:[#allocation7 + $0x254] sm:$0xf]  ;;  %v2069_v36 = vor.u32 %v2643_v27, %v2066_v28  ;;  %v2641_v38 = vld [vmem:[#allocation7 + $0x4f4] sm:$0xf0]  ;;  %v2639_v39 = vld [vmem:[#allocation7 + $0x49c] sm:$0xf] }
  0x41   :  { %412 = vmatpush.bf16.msrb.mxu1 %v1909_v32  ;;  %629 = vmatpush.bf16.msrb.mxu2 %v2057_v41  ;;  %v1994_v32 = vld [vmem:[#allocation7 + $0x2b0] sm:$0xf0]  ;;  %v2050_v40 = vld [vmem:[#allocation7 + $0x4f8] sm:$0xf0]  ;;  %v2049_v42 = vor.u32 %v2641_v38, %v2048_v37  ;;  %v2032_v44 = vld [vmem:[#allocation7 + $0x3d8] sm:$0xf] }
  0x42   :  { %642 = vmatpush.bf16.msrb.mxu3 %v2061_v53  ;;  %v1997_v41 = vor.u32 %v2626_v31, %v1994_v32  ;;  %v2053_v43 = vor.u32 %v2639_v39, %v2050_v40  ;;  %v2637_v45 = vld [vmem:[#allocation7 + $0x434] sm:$0xf0]  ;;  %v2631_v52 = vld [vmem:[#allocation7 + $0x31c] sm:$0xf]  ;;  %v2624_v63 = vld [vmem:[#allocation7 + $0x1ec] sm:$0xf0] }
  0x43   :  { %v2033_v48 = vor.u32 %v2637_v45, %v2032_v44  ;;  %v2016_v50 = vld [vmem:[#allocation7 + $0x318] sm:$0xf]  ;;  %v2018_v53 = vld [vmem:[#allocation7 + $0x378] sm:$0xf0]  ;;  %v2622_v0 = vld [vmem:[#allocation7 + $0x194] sm:$0xf] }
  0x44   :  { %400 = vmatpush.bf16.msrb.mxu0 %v1889_v46  ;;  %v2635_v46 = vld [vmem:[#allocation7 + $0x3dc] sm:$0xf]  ;;  %v2633_v51 = vld [vmem:[#allocation7 + $0x374] sm:$0xf0]  ;;  %v2021_v55 = vor.u32 %v2631_v52, %v2018_v53  ;;  %v1960_v10 = vld [vmem:[#allocation7 + $0xd0] sm:$0xf] }
  0x45   :  { %413 = vmatpush.bf16.msrb.mxu1 %v1893_v47  ;;  %630 = vmatpush.bf16.msrb.mxu2 %v2041_v54  ;;  %v2034_v47 = vld [vmem:[#allocation7 + $0x438] sm:$0xf0]  ;;  %v2017_v54 = vor.u32 %v2633_v51, %v2016_v50  ;;  %v2000_v56 = vld [vmem:[#allocation7 + $0x258] sm:$0xf]  ;;  %v2620_v11 = vld [vmem:[#allocation7 + $0x12c] sm:$0xf0] }
  0x46   :  { %643 = vmatpush.bf16.msrb.mxu3 %v2045_v1  ;;  %v2037_v49 = vor.u32 %v2635_v46, %v2034_v47  ;;  %v2629_v57 = vld [vmem:[#allocation7 + $0x2b4] sm:$0xf0]  ;;  %v2627_v58 = vld [vmem:[#allocation7 + $0x25c] sm:$0xf]  ;;  %v1977_v1 = vor.u32 %v2624_v63, %v1976_v62  ;;  %v2618_v12 = vld [vmem:[#allocation7 + $0xd4] sm:$0xf] }
  0x47   :  { %v1984_v3 = vld [vmem:[#allocation7 + $0x198] sm:$0xf]  ;;  %v1944_v22 = vld [vmem:[#allocation7 + $0x10] sm:$0xf]  ;;  %v2614_v24 = vld [vmem:[#allocation7 + $0x14] sm:$0xf] }
  0x48   :  { %401 = vmatpush.bf16.msrb.mxu0 %v1873_v59  ;;  %v2002_v59 = vld [vmem:[#allocation7 + $0x2b8] sm:$0xf0]  ;;  %v2625_v4 = vld [vmem:[#allocation7 + $0x1f4] sm:$0xf0]  ;;  %v2616_v23 = vld [vmem:[#allocation7 + $0x6c] sm:$0xf0] }
  0x49   :  { %414 = vmatpush.bf16.msrb.mxu1 %v1877_v60  ;;  %631 = vmatpush.bf16.msrb.mxu2 %v2025_v2  ;;  %v2001_v60 = vor.u32 %v2629_v57, %v2000_v56  ;;  %v2005_v61 = vor.u32 %v2627_v58, %v2002_v59  ;;  %v1978_v2 = vld [vmem:[#allocation7 + $0x1f0] sm:$0xf0]  ;;  %v1985_v6 = vor.u32 %v2625_v4, %v1984_v3  ;;  %v1968_v15 = vld [vmem:[#allocation7 + $0xd8] sm:$0xf]  ;;  %v2615_v31 = vld [vmem:[#allocation7 + $0x1c] sm:$0xf] }
  0x4a   :  { %644 = vmatpush.bf16.msrb.mxu3 %v2029_v13  ;;  %v1981_v5 = vor.u32 %v2622_v0, %v1978_v2  ;;  %v1961_v13 = vor.u32 %v2620_v11, %v1960_v10  ;;  %v2621_v16 = vld [vmem:[#allocation7 + $0x134] sm:$0xf0]  ;;  %v1945_v25 = vor.u32 %v2616_v23, %v1944_v22  ;;  %v1946_v26 = vld [vmem:[#allocation7 + $0x70] sm:$0xf0]  ;;  %v1954_v32 = vld [vmem:[#allocation7 + $0x78] sm:$0xf0] }
  0x4b   :  { %v1969_v18 = vor.u32 %v2621_v16, %v1968_v15  ;;  %v1952_v27 = vld [vmem:[#allocation7 + $0x18] sm:$0xf]  ;;  %v2184_v39 = vld [vmem:[#allocation7 + $0x560] sm:$0xf]  ;;  %v2677_v44 = vld [vmem:[#allocation7 + $0x5c4] sm:$0xf0] }
  0x4c   :  { %402 = vmatpush.bf16.msrb.mxu0 %v1857_v7  ;;  %v2623_v7 = vld [vmem:[#allocation7 + $0x19c] sm:$0xf]  ;;  %v2617_v28 = vld [vmem:[#allocation7 + $0x74] sm:$0xf0]  ;;  %v2676_v40 = vld [vmem:[#allocation7 + $0x5bc] sm:$0xf0] }
  0x4d   :  { %415 = vmatpush.bf16.msrb.mxu1 %v1861_v8  ;;  %632 = vmatpush.bf16.msrb.mxu2 %v2009_v14  ;;  %v1986_v8 = vld [vmem:[#allocation7 + $0x1f8] sm:$0xf0]  ;;  %v1962_v14 = vld [vmem:[#allocation7 + $0x130] sm:$0xf0]  ;;  %v2675_v46 = vld [vmem:[#allocation7 + $0x56c] sm:$0xf] }
  0x4e   :  { %645 = vmatpush.bf16.msrb.mxu3 %v2013_v29  ;;  %v1989_v9 = vor.u32 %v2623_v7, %v1986_v8  ;;  %v1965_v17 = vor.u32 %v2618_v12, %v1962_v14  ;;  %v1949_v29 = vor.u32 %v2614_v24, %v1946_v26  ;;  %v2194_v47 = vld [vmem:[#allocation7 + $0x5c8] sm:$0xf0]  ;;  %v2168_v51 = vld [vmem:[#allocation7 + $0x4a0] sm:$0xf]  ;;  %v2170_v56 = vld [vmem:[#allocation7 + $0x500] sm:$0xf0] }
  0x4f   :  { %v2672_v52 = vld [vmem:[#allocation7 + $0x4fc] sm:$0xf0]  ;;  %v2176_v57 = vld [vmem:[#allocation7 + $0x4a8] sm:$0xf]  ;;  %v2671_v59 = vld [vmem:[#allocation7 + $0x4ac] sm:$0xf] }
  0x50   :  { %403 = vmatpush.bf16.msrb.mxu0 %v1841_v19  ;;  %v2619_v19 = vld [vmem:[#allocation7 + $0xdc] sm:$0xf]  ;;  %v2673_v58 = vld [vmem:[#allocation7 + $0x504] sm:$0xf0]  ;;  %v2152_v63 = vld [vmem:[#allocation7 + $0x3e0] sm:$0xf] }
  0x51   :  { %416 = vmatpush.bf16.msrb.mxu1 %v1845_v20  ;;  %633 = vmatpush.bf16.msrb.mxu2 %v1993_v30  ;;  %v1970_v20 = vld [vmem:[#allocation7 + $0x138] sm:$0xf0]  ;;  %v1953_v30 = vor.u32 %v2617_v28, %v1952_v27  ;;  %v2668_v0 = vld [vmem:[#allocation7 + $0x43c] sm:$0xf0]  ;;  %v2666_v3 = vld [vmem:[#allocation7 + $0x3e4] sm:$0xf] }
  0x52   :  { %646 = vmatpush.bf16.msrb.mxu3 %v1997_v41  ;;  %v1973_v21 = vor.u32 %v2619_v19, %v1970_v20  ;;  %v2674_v41 = vld [vmem:[#allocation7 + $0x564] sm:$0xf]  ;;  %v2667_v7 = vld [vmem:[#allocation7 + $0x3ec] sm:$0xf]  ;;  %v2136_v11 = vld [vmem:[#allocation7 + $0x320] sm:$0xf] }
  0x53   :  { %v2154_v4 = vld [vmem:[#allocation7 + $0x440] sm:$0xf0]  ;;  %v2162_v8 = vld [vmem:[#allocation7 + $0x448] sm:$0xf0]  ;;  %v2664_v12 = vld [vmem:[#allocation7 + $0x37c] sm:$0xf0] }
  0x54   :  { %404 = vmatpush.bf16.msrb.mxu0 %v1825_v33  ;;  %v1957_v33 = vor.u32 %v2615_v31, %v1954_v32  ;;  %v2157_v10 = vor.u32 %v2666_v3, %v2154_v4  ;;  %v2165_v14 = vor.u32 %v2667_v7, %v2162_v8  ;;  %v2662_v15 = vld [vmem:[#allocation7 + $0x324] sm:$0xf]  ;;  %v2663_v19 = vld [vmem:[#allocation7 + $0x32c] sm:$0xf]  ;;  %v2120_v23 = vld [vmem:[#allocation7 + $0x260] sm:$0xf] }
  0x55   :  { %417 = vmatpush.bf16.msrb.mxu1 %v1829_v34  ;;  %634 = vmatpush.bf16.msrb.mxu2 %v1977_v1  ;;  %v2788_v34 = vld [vmem:[%s3173_s2] ss:$0 sm:$0xff]  ;;  %v2177_v1 = vor.u32 %v2673_v58, %v2176_v57  ;;  %v2138_v16 = vld [vmem:[#allocation7 + $0x380] sm:$0xf0]  ;;  %v2146_v20 = vld [vmem:[#allocation7 + $0x388] sm:$0xf0] }
  0x56   :  { %647 = vmatpush.bf16.msrb.mxu3 %v1981_v5  ;;  %v2160_v5 = vld [vmem:[#allocation7 + $0x3e8] sm:$0xf]  ;;  %v2141_v22 = vor.u32 %v2662_v15, %v2138_v16  ;;  %v2660_v24 = vld [vmem:[#allocation7 + $0x2bc] sm:$0xf0]  ;;  %v2149_v26 = vor.u32 %v2663_v19, %v2146_v20  ;;  %v2658_v27 = vld [vmem:[#allocation7 + $0x264] sm:$0xf] }
  0x57   :  { %v2122_v28 = vld [vmem:[#allocation7 + $0x2c0] sm:$0xf0]  ;;  %v2659_v31 = vld [vmem:[#allocation7 + $0x26c] sm:$0xf]  ;;  %v2072_v58 = vld [vmem:[#allocation7 + $0x20] sm:$0xf] }
  0x58   :  { %655 = vmatpush.bf16.msra.mxu0 %v2065_v35  ;;  %v2130_v32 = vld [vmem:[#allocation7 + $0x2c8] sm:$0xf0]  ;;  %v2649_v3 = vld [vmem:[#allocation7 + $0x84] sm:$0xf0]  ;;  %v2708_v7 = vld [vmem:[#allocation7 + $0x5cc] sm:$0xf0] }
  0x59   :  { %668 = vmatpush.bf16.msra.mxu1 %v2069_v36  ;;  %635 = vmatpush.bf16.msrb.mxu2 %v1961_v13  ;;  %v2098_v57 = vld [vmem:[#allocation7 + $0x148] sm:$0xf0]  ;;  %v2706_v8 = vld [vmem:[#allocation7 + $0x574] sm:$0xf]  ;;  %v2322_v15 = vld [vmem:[#allocation7 + $0x5d8] sm:$0xf0] }
  0x5a   :  { %648 = vmatpush.bf16.msrb.mxu3 %v1965_v17  ;;  %v2144_v17 = vld [vmem:[#allocation7 + $0x328] sm:$0xf]  ;;  %v2647_v4 = vld [vmem:[#allocation7 + $0x2c] sm:$0xf]  ;;  %v2296_v20 = vld [vmem:[#allocation7 + $0x4b0] sm:$0xf] }
  0x5c   :  { %656 = vmatpush.bf16.msra.mxu0 %v2049_v42  ;;  %v2186_v42 = vld [vmem:[#allocation7 + $0x5c0] sm:$0xf0] }
  0x5d   :  { %669 = vmatpush.bf16.msra.mxu1 %v2053_v43  ;;  %636 = vmatpush.bf16.msrb.mxu2 %v1945_v25  ;;  %v2192_v43 = vld [vmem:[#allocation7 + $0x568] sm:$0xf]  ;;  %v2189_v50 = vor.u32 %v2674_v41, %v2186_v42 }
  0x5e   :  { %649 = vmatpush.bf16.msrb.mxu3 %v1949_v29  ;;  %v2193_v53 = vor.u32 %v2677_v44, %v2192_v43  ;;  %v2128_v29 = vld [vmem:[#allocation7 + $0x268] sm:$0xf]  ;;  %v2655_v43 = vld [vmem:[#allocation7 + $0x1ac] sm:$0xf] }
  0x5f   :  { %v2112_v41 = vld [vmem:[#allocation7 + $0x1a8] sm:$0xf]  ;;  %v2114_v44 = vld [vmem:[#allocation7 + $0x208] sm:$0xf0] }
  0x60   :  { %657 = vmatpush.bf16.msra.mxu0 %v2033_v48  ;;  %v2657_v42 = vld [vmem:[#allocation7 + $0x204] sm:$0xf0] }
  0x61   :  { %670 = vmatpush.bf16.msra.mxu1 %v2037_v49  ;;  %v2185_v49 = vor.u32 %v2676_v40, %v2184_v39  ;;  %v2654_v39 = vld [vmem:[#allocation7 + $0x1a4] sm:$0xf] }
  0x62   :  { %v2106_v40 = vld [vmem:[#allocation7 + $0x200] sm:$0xf0] }
  0x64   :  { %658 = vmatpush.bf16.msra.mxu0 %v2017_v54  ;;  %v2197_v54 = vor.u32 %v2675_v46, %v2194_v47  ;;  %v2109_v46 = vor.u32 %v2654_v39, %v2106_v40  ;;  %v2088_v47 = vld [vmem:[#allocation7 + $0xe0] sm:$0xf]  ;;  %v2701_v39 = vld [vmem:[#allocation7 + $0x454] sm:$0xf0]  ;;  %v2699_v40 = vld [vmem:[#allocation7 + $0x3fc] sm:$0xf] }
  0x65   :  { %671 = vmatpush.bf16.msra.mxu1 %v2021_v55  ;;  %v2670_v55 = vld [vmem:[#allocation7 + $0x4a4] sm:$0xf] }
  0x66   :  { %v2173_v62 = vor.u32 %v2670_v55, %v2170_v56  ;;  %v2653_v55 = vld [vmem:[#allocation7 + $0x144] sm:$0xf0]  ;;  %v2651_v56 = vld [vmem:[#allocation7 + $0xec] sm:$0xf] }
  0x68   :  { %659 = vmatpush.bf16.msra.mxu0 %v2001_v60  ;;  %v2178_v60 = vld [vmem:[#allocation7 + $0x508] sm:$0xf0] }
  0x69   :  { %672 = vmatpush.bf16.msra.mxu1 %v2005_v61  ;;  %v2169_v61 = vor.u32 %v2672_v52, %v2168_v51  ;;  %v2181_v2 = vor.u32 %v2671_v59, %v2178_v60  ;;  %v2117_v51 = vor.u32 %v2655_v43, %v2114_v44  ;;  %v2650_v52 = vld [vmem:[#allocation7 + $0xe4] sm:$0xf]  ;;  %v2264_v44 = vld [vmem:[#allocation7 + $0x330] sm:$0xf] }
  0x6c   :  { %660 = vmatpush.bf16.msra.mxu0 %v1985_v6  ;;  %v2669_v6 = vld [vmem:[#allocation7 + $0x444] sm:$0xf0] }
  0x6d   :  { %673 = vmatpush.bf16.msra.mxu1 %v1989_v9  ;;  %v2153_v9 = vor.u32 %v2668_v0, %v2152_v63  ;;  %v2161_v13 = vor.u32 %v2669_v6, %v2160_v5  ;;  %v2074_v63 = vld [vmem:[#allocation7 + $0x80] sm:$0xf0]  ;;  %v2082_v5 = vld [vmem:[#allocation7 + $0x88] sm:$0xf0]  ;;  %v2312_v6 = vld [vmem:[#allocation7 + $0x570] sm:$0xf] }
  0x70   :  { %661 = vmatpush.bf16.msra.mxu0 %v1969_v18  ;;  %v2665_v18 = vld [vmem:[#allocation7 + $0x384] sm:$0xf0] }
  0x71   :  { %674 = vmatpush.bf16.msra.mxu1 %v1973_v21  ;;  %v2137_v21 = vor.u32 %v2664_v12, %v2136_v11  ;;  %v2145_v25 = vor.u32 %v2665_v18, %v2144_v17  ;;  %v2085_v17 = vor.u32 %v2647_v4, %v2082_v5  ;;  %v2313_v18 = vor.u32 %v2708_v7, %v2312_v6  ;;  %v2232_v5 = vld [vmem:[#allocation7 + $0x1b0] sm:$0xf] }
  0x72   :  { %v2688_v6 = vld [vmem:[#allocation7 + $0x20c] sm:$0xf0] }
  0x74   :  { %662 = vmatpush.bf16.msra.mxu0 %v1953_v30  ;;  %v2661_v30 = vld [vmem:[#allocation7 + $0x2c4] sm:$0xf0] }
  0x75   :  { %675 = vmatpush.bf16.msra.mxu1 %v1957_v33  ;;  %v2121_v33 = vor.u32 %v2660_v24, %v2120_v23  ;;  %v2702_v24 = vld [vmem:[#allocation7 + $0x4b4] sm:$0xf] }
  0xb4   :  { %v144_v35 = vpop.f32.mrf.mxu0 }
  0xb5   :  { %v164_v36 = vpop.f32.mrf.mxu1  ;;  %v145_v37 = vadd.f32 %v2788_v34, %v144_v35  ;;  %v2125_v34 = vor.u32 %v2658_v27, %v2122_v28  ;;  %v2104_v35 = vld [vmem:[#allocation7 + $0x1a0] sm:$0xf]  ;;  %v2705_v27 = vld [vmem:[#allocation7 + $0x514] sm:$0xf0]  ;;  %v2703_v28 = vld [vmem:[#allocation7 + $0x4bc] sm:$0xf] }
  0xb7   :  { %v165_v38 = vadd.f32 %v164_v36, %v145_v37  ;;  %v2656_v36 = vld [vmem:[#allocation7 + $0x1fc] sm:$0xf0]  ;;  %v2129_v37 = vor.u32 %v2661_v30, %v2128_v29  ;;  %v2306_v29 = vld [vmem:[#allocation7 + $0x518] sm:$0xf0] }
  0xb9   :  { %v167_v45 = vmax.f32 %v165_v38, 0.0  ;;  %v2133_v38 = vor.u32 %v2659_v31, %v2130_v32  ;;  %v2280_v32 = vld [vmem:[#allocation7 + $0x3f0] sm:$0xf] }
  0xbb   :  { %v3127_v48 = vpack.c.bf16 %v167_v45, %v167_v45  ;;  %v2105_v45 = vor.u32 %v2656_v36, %v2104_v35  ;;  %v2309_v35 = vor.u32 %v2703_v28, %v2306_v29  ;;  %v2698_v36 = vld [vmem:[#allocation7 + $0x3f4] sm:$0xf] }
  0xbd   :  { %379 = vmatmul.bf16.vlgmr.msra.gmra.mxu2 %v3127_v48  ;;  %392 = vmatmul.bf16.vlgmr.msra.gmra.mxu3 %v3127_v48 }
  0xbe   :  { %405 = vmatmul.bf16.vlgmr.msrb.gmra.mxu0 %v3127_v48  ;;  %418 = vmatmul.bf16.vlgmr.msrb.gmra.mxu1 %v3127_v48 }
  0xbf   :  { %887 = vmatpush.bf16.msra.mxu2 %v2185_v49  ;;  %900 = vmatpush.bf16.msra.mxu3 %v2189_v50  ;;  %v2652_v49 = vld [vmem:[#allocation7 + $0x13c] sm:$0xf0]  ;;  %v2113_v50 = vor.u32 %v2657_v42, %v2112_v41  ;;  %v2290_v41 = vld [vmem:[#allocation7 + $0x458] sm:$0xf0] }
  0xc0   :  { %913 = vmatpush.bf16.msrb.mxu0 %v2193_v53  ;;  %926 = vmatpush.bf16.msrb.mxu1 %v2197_v54  ;;  %v2090_v53 = vld [vmem:[#allocation7 + $0x140] sm:$0xf0]  ;;  %v2096_v54 = vld [vmem:[#allocation7 + $0xe8] sm:$0xf]  ;;  %v2089_v59 = vor.u32 %v2652_v49, %v2088_v47  ;;  %v2293_v47 = vor.u32 %v2699_v40, %v2290_v41  ;;  %v2694_v49 = vld [vmem:[#allocation7 + $0x334] sm:$0xf] }
  0xc1   :  { %v2093_v60 = vor.u32 %v2650_v52, %v2090_v53  ;;  %v2097_v0 = vor.u32 %v2653_v55, %v2096_v54  ;;  %v2697_v52 = vld [vmem:[#allocation7 + $0x394] sm:$0xf0]  ;;  %v2695_v53 = vld [vmem:[#allocation7 + $0x33c] sm:$0xf]  ;;  %v2740_v40 = vld [vmem:[#allocation7 + $0x5dc] sm:$0xf0] }
  0xc2   :  { %v2274_v54 = vld [vmem:[#allocation7 + $0x398] sm:$0xf0]  ;;  %v2738_v41 = vld [vmem:[#allocation7 + $0x584] sm:$0xf] }
  0xc3   :  { %888 = vmatpush.bf16.msra.mxu2 %v2169_v61  ;;  %901 = vmatpush.bf16.msra.mxu3 %v2173_v62  ;;  %v2648_v61 = vld [vmem:[#allocation7 + $0x7c] sm:$0xf0]  ;;  %v2646_v62 = vld [vmem:[#allocation7 + $0x24] sm:$0xf] }
  0xc4   :  { %914 = vmatpush.bf16.msrb.mxu0 %v2177_v1  ;;  %927 = vmatpush.bf16.msrb.mxu1 %v2181_v2  ;;  %v2101_v1 = vor.u32 %v2651_v56, %v2098_v57  ;;  %v2080_v2 = vld [vmem:[#allocation7 + $0x28] sm:$0xf]  ;;  %v2073_v11 = vor.u32 %v2648_v61, %v2072_v58  ;;  %v2077_v12 = vor.u32 %v2646_v62, %v2074_v63  ;;  %v2248_v57 = vld [vmem:[#allocation7 + $0x270] sm:$0xf]  ;;  %v2690_v61 = vld [vmem:[#allocation7 + $0x274] sm:$0xf] }
  0xc5   :  { %v2081_v16 = vor.u32 %v2649_v3, %v2080_v2  ;;  %v2692_v58 = vld [vmem:[#allocation7 + $0x2cc] sm:$0xf0]  ;;  %v2250_v62 = vld [vmem:[#allocation7 + $0x2d0] sm:$0xf0]  ;;  %v2256_v63 = vld [vmem:[#allocation7 + $0x278] sm:$0xf] }
  0xc6   :  { %v2258_v2 = vld [vmem:[#allocation7 + $0x2d8] sm:$0xf0]  ;;  %v2249_v3 = vor.u32 %v2692_v58, %v2248_v57  ;;  %v2253_v4 = vor.u32 %v2690_v61, %v2250_v62  ;;  %v2734_v58 = vld [vmem:[#allocation7 + $0x4c4] sm:$0xf]  ;;  %v2737_v61 = vld [vmem:[#allocation7 + $0x524] sm:$0xf0] }
  0xc7   :  { %889 = vmatpush.bf16.msra.mxu2 %v2153_v9  ;;  %902 = vmatpush.bf16.msra.mxu3 %v2157_v10  ;;  %v2314_v9 = vld [vmem:[#allocation7 + $0x5d0] sm:$0xf0]  ;;  %v2320_v10 = vld [vmem:[#allocation7 + $0x578] sm:$0xf]  ;;  %v2735_v62 = vld [vmem:[#allocation7 + $0x4cc] sm:$0xf] }
  0xc8   :  { %915 = vmatpush.bf16.msrb.mxu0 %v2161_v13  ;;  %928 = vmatpush.bf16.msrb.mxu1 %v2165_v14  ;;  %v2709_v13 = vld [vmem:[#allocation7 + $0x5d4] sm:$0xf0]  ;;  %v2707_v14 = vld [vmem:[#allocation7 + $0x57c] sm:$0xf]  ;;  %v2317_v19 = vor.u32 %v2706_v8, %v2314_v9  ;;  %v2686_v9 = vld [vmem:[#allocation7 + $0x1b4] sm:$0xf] }
  0xc9   :  { %v2325_v23 = vor.u32 %v2707_v14, %v2322_v15  ;;  %v2242_v14 = vld [vmem:[#allocation7 + $0x218] sm:$0xf0]  ;;  %v2233_v15 = vor.u32 %v2688_v6, %v2232_v5  ;;  %v2730_v6 = vld [vmem:[#allocation7 + $0x404] sm:$0xf] }
  0xcb   :  { %890 = vmatpush.bf16.msra.mxu2 %v2137_v21  ;;  %903 = vmatpush.bf16.msra.mxu3 %v2141_v22  ;;  %v2704_v21 = vld [vmem:[#allocation7 + $0x50c] sm:$0xf0]  ;;  %v2321_v22 = vor.u32 %v2709_v13, %v2320_v10  ;;  %v2234_v10 = vld [vmem:[#allocation7 + $0x210] sm:$0xf0]  ;;  %v2687_v13 = vld [vmem:[#allocation7 + $0x1bc] sm:$0xf] }
  0xcc   :  { %916 = vmatpush.bf16.msrb.mxu0 %v2145_v25  ;;  %929 = vmatpush.bf16.msrb.mxu1 %v2149_v26  ;;  %v2298_v25 = vld [vmem:[#allocation7 + $0x510] sm:$0xf0]  ;;  %v2304_v26 = vld [vmem:[#allocation7 + $0x4b8] sm:$0xf]  ;;  %v2297_v30 = vor.u32 %v2704_v21, %v2296_v20  ;;  %v2245_v20 = vor.u32 %v2687_v13, %v2242_v14  ;;  %v2392_v14 = vld [vmem:[#allocation7 + $0x340] sm:$0xf] }
  0xcd   :  { %637 = vmatmul.bf16.vlgmr.msrb.gmra.mxu2 %v3127_v48  ;;  %650 = vmatmul.bf16.vlgmr.msrb.gmra.mxu3 %v3127_v48  ;;  %v2301_v31 = vor.u32 %v2702_v24, %v2298_v25  ;;  %v2682_v21 = vld [vmem:[#allocation7 + $0xf4] sm:$0xf]  ;;  %v2685_v24 = vld [vmem:[#allocation7 + $0x154] sm:$0xf0]  ;;  %v2683_v25 = vld [vmem:[#allocation7 + $0xfc] sm:$0xf] }
  0xce   :  { %663 = vmatmul.bf16.vlgmr.msra.gmra.mxu0 %v3127_v48  ;;  %676 = vmatmul.bf16.vlgmr.msra.gmra.mxu1 %v3127_v48 }
  0xcf   :  { %891 = vmatpush.bf16.msra.mxu2 %v2121_v33  ;;  %904 = vmatpush.bf16.msra.mxu3 %v2125_v34  ;;  %v2700_v33 = vld [vmem:[#allocation7 + $0x44c] sm:$0xf0]  ;;  %v2305_v34 = vor.u32 %v2705_v27, %v2304_v26  ;;  %v2226_v26 = vld [vmem:[#allocation7 + $0x158] sm:$0xf0] }
  0xd0   :  { %917 = vmatpush.bf16.msrb.mxu0 %v2129_v37  ;;  %930 = vmatpush.bf16.msrb.mxu1 %v2133_v38  ;;  %v2282_v37 = vld [vmem:[#allocation7 + $0x450] sm:$0xf0]  ;;  %v2288_v38 = vld [vmem:[#allocation7 + $0x3f8] sm:$0xf]  ;;  %v2281_v42 = vor.u32 %v2700_v33, %v2280_v32  ;;  %v2200_v27 = vld [vmem:[#allocation7 + $0x30] sm:$0xf] }
  0xd1   :  { %v2285_v43 = vor.u32 %v2698_v36, %v2282_v37  ;;  %v2202_v32 = vld [vmem:[#allocation7 + $0x90] sm:$0xf0]  ;;  %v2681_v36 = vld [vmem:[#allocation7 + $0x94] sm:$0xf0]  ;;  %v2679_v37 = vld [vmem:[#allocation7 + $0x3c] sm:$0xf] }
  0xd3   :  { %892 = vmatpush.bf16.msra.mxu2 %v2105_v45  ;;  %905 = vmatpush.bf16.msra.mxu3 %v2109_v46  ;;  %v2696_v45 = vld [vmem:[#allocation7 + $0x38c] sm:$0xf0]  ;;  %v2289_v46 = vor.u32 %v2701_v39, %v2288_v38  ;;  %v2210_v38 = vld [vmem:[#allocation7 + $0x98] sm:$0xf0]  ;;  %v2440_v39 = vld [vmem:[#allocation7 + $0x580] sm:$0xf] }
  0xd4   :  { %918 = vmatpush.bf16.msrb.mxu0 %v2113_v50  ;;  %931 = vmatpush.bf16.msrb.mxu1 %v2117_v51  ;;  %v2266_v50 = vld [vmem:[#allocation7 + $0x390] sm:$0xf0]  ;;  %v2272_v51 = vld [vmem:[#allocation7 + $0x338] sm:$0xf]  ;;  %v2265_v55 = vor.u32 %v2696_v45, %v2264_v44 }
  0xd5   :  { %v2269_v56 = vor.u32 %v2694_v49, %v2266_v50  ;;  %v2450_v49 = vld [vmem:[#allocation7 + $0x5e8] sm:$0xf0] }
  0xd7   :  { %893 = vmatpush.bf16.msra.mxu2 %v2089_v59  ;;  %906 = vmatpush.bf16.msra.mxu3 %v2093_v60  ;;  %v2273_v59 = vor.u32 %v2697_v52, %v2272_v51  ;;  %v2277_v60 = vor.u32 %v2695_v53, %v2274_v54  ;;  %v2213_v51 = vor.u32 %v2679_v37, %v2210_v38  ;;  %v2424_v54 = vld [vmem:[#allocation7 + $0x4c0] sm:$0xf] }
  0xd8   :  { %919 = vmatpush.bf16.msrb.mxu0 %v2097_v0  ;;  %932 = vmatpush.bf16.msrb.mxu1 %v2101_v1  ;;  %v2693_v0 = vld [vmem:[#allocation7 + $0x2d4] sm:$0xf0]  ;;  %v2691_v1 = vld [vmem:[#allocation7 + $0x27c] sm:$0xf]  ;;  %v2441_v52 = vor.u32 %v2740_v40, %v2440_v39  ;;  %v2360_v38 = vld [vmem:[#allocation7 + $0x1c0] sm:$0xf] }
  0xd9   :  { %v2257_v7 = vor.u32 %v2693_v0, %v2256_v63  ;;  %v2261_v8 = vor.u32 %v2691_v1, %v2258_v2  ;;  %v2434_v63 = vld [vmem:[#allocation7 + $0x528] sm:$0xf0]  ;;  %v2408_v2 = vld [vmem:[#allocation7 + $0x400] sm:$0xf] }
  0xda   :  { %v2437_v5 = vor.u32 %v2735_v62, %v2434_v63  ;;  %v2720_v39 = vld [vmem:[#allocation7 + $0x21c] sm:$0xf0] }
  0xdb   :  { %894 = vmatpush.bf16.msra.mxu2 %v2073_v11  ;;  %907 = vmatpush.bf16.msra.mxu3 %v2077_v12  ;;  %v2240_v11 = vld [vmem:[#allocation7 + $0x1b8] sm:$0xf] }
  0xdc   :  { %920 = vmatpush.bf16.msrb.mxu0 %v2081_v16  ;;  %933 = vmatpush.bf16.msrb.mxu1 %v2085_v17  ;;  %v2689_v12 = vld [vmem:[#allocation7 + $0x214] sm:$0xf0]  ;;  %v2237_v16 = vor.u32 %v2686_v9, %v2234_v10  ;;  %v2216_v17 = vld [vmem:[#allocation7 + $0xf0] sm:$0xf]  ;;  %v2733_v9 = vld [vmem:[#allocation7 + $0x464] sm:$0xf0] }
  0xdd   :  { %v2731_v10 = vld [vmem:[#allocation7 + $0x40c] sm:$0xf] }
  0xde   :  { %895 = vmatmul.bf16.vlgmr.msra.gmra.mxu2 %v3127_v48  ;;  %908 = vmatmul.bf16.vlgmr.msra.gmra.mxu3 %v3127_v48 }
  0xdf   :  { %1145 = vmatpush.bf16.msrb.mxu2 %v2313_v18  ;;  %1158 = vmatpush.bf16.msrb.mxu3 %v2317_v19  ;;  %v2684_v18 = vld [vmem:[#allocation7 + $0x14c] sm:$0xf0]  ;;  %v2241_v19 = vor.u32 %v2689_v12, %v2240_v11  ;;  %v2418_v11 = vld [vmem:[#allocation7 + $0x468] sm:$0xf0] }
  0xe0   :  { %1171 = vmatpush.bf16.msra.mxu0 %v2321_v22  ;;  %1184 = vmatpush.bf16.msra.mxu1 %v2325_v23  ;;  %v2218_v22 = vld [vmem:[#allocation7 + $0x150] sm:$0xf0]  ;;  %v2224_v23 = vld [vmem:[#allocation7 + $0xf8] sm:$0xf]  ;;  %v2217_v28 = vor.u32 %v2684_v18, %v2216_v17  ;;  %v2421_v17 = vor.u32 %v2731_v10, %v2418_v11  ;;  %v2726_v18 = vld [vmem:[#allocation7 + $0x344] sm:$0xf] }
  0xe1   :  { %921 = vmatmul.bf16.vlgmr.msrb.gmra.mxu0 %v3127_v48  ;;  %934 = vmatmul.bf16.vlgmr.msrb.gmra.mxu1 %v3127_v48  ;;  %v2221_v29 = vor.u32 %v2682_v21, %v2218_v22  ;;  %v2225_v33 = vor.u32 %v2685_v24, %v2224_v23  ;;  %v2729_v21 = vld [vmem:[#allocation7 + $0x3a4] sm:$0xf0]  ;;  %v2727_v22 = vld [vmem:[#allocation7 + $0x34c] sm:$0xf]  ;;  %v2772_v10 = vld [vmem:[#allocation7 + $0x5ec] sm:$0xf0] }
  0xe2   :  { %v2402_v23 = vld [vmem:[#allocation7 + $0x3a8] sm:$0xf0]  ;;  %v2770_v11 = vld [vmem:[#allocation7 + $0x594] sm:$0xf] }
  0xe3   :  { %1146 = vmatpush.bf16.msrb.mxu2 %v2297_v30  ;;  %1159 = vmatpush.bf16.msrb.mxu3 %v2301_v31  ;;  %v2680_v30 = vld [vmem:[#allocation7 + $0x8c] sm:$0xf0]  ;;  %v2678_v31 = vld [vmem:[#allocation7 + $0x34] sm:$0xf] }
  0xe4   :  { %1172 = vmatpush.bf16.msra.mxu0 %v2305_v34  ;;  %1185 = vmatpush.bf16.msra.mxu1 %v2309_v35  ;;  %v2229_v34 = vor.u32 %v2683_v25, %v2226_v26  ;;  %v2208_v35 = vld [vmem:[#allocation7 + $0x38] sm:$0xf]  ;;  %v2201_v44 = vor.u32 %v2680_v30, %v2200_v27  ;;  %v2205_v45 = vor.u32 %v2678_v31, %v2202_v32  ;;  %v2376_v26 = vld [vmem:[#allocation7 + $0x280] sm:$0xf]  ;;  %v2722_v30 = vld [vmem:[#allocation7 + $0x284] sm:$0xf] }
  0xe5   :  { %v2209_v50 = vor.u32 %v2681_v36, %v2208_v35  ;;  %v2724_v27 = vld [vmem:[#allocation7 + $0x2dc] sm:$0xf0]  ;;  %v2378_v31 = vld [vmem:[#allocation7 + $0x2e0] sm:$0xf0]  ;;  %v2384_v32 = vld [vmem:[#allocation7 + $0x288] sm:$0xf] }
  0xe6   :  { %v2386_v35 = vld [vmem:[#allocation7 + $0x2e8] sm:$0xf0]  ;;  %v2377_v36 = vor.u32 %v2724_v27, %v2376_v26  ;;  %v2381_v37 = vor.u32 %v2722_v30, %v2378_v31  ;;  %v2766_v27 = vld [vmem:[#allocation7 + $0x4d4] sm:$0xf]  ;;  %v2769_v30 = vld [vmem:[#allocation7 + $0x534] sm:$0xf0] }
  0xe7   :  { %1147 = vmatpush.bf16.msrb.mxu2 %v2281_v42  ;;  %1160 = vmatpush.bf16.msrb.mxu3 %v2285_v43  ;;  %v2442_v42 = vld [vmem:[#allocation7 + $0x5e0] sm:$0xf0]  ;;  %v2448_v43 = vld [vmem:[#allocation7 + $0x588] sm:$0xf]  ;;  %v2767_v31 = vld [vmem:[#allocation7 + $0x4dc] sm:$0xf] }
  0xe8   :  { %1173 = vmatpush.bf16.msra.mxu0 %v2289_v46  ;;  %1186 = vmatpush.bf16.msra.mxu1 %v2293_v47  ;;  %v2741_v46 = vld [vmem:[#allocation7 + $0x5e4] sm:$0xf0]  ;;  %v2739_v47 = vld [vmem:[#allocation7 + $0x58c] sm:$0xf]  ;;  %v2445_v53 = vor.u32 %v2738_v41, %v2442_v42  ;;  %v2718_v42 = vld [vmem:[#allocation7 + $0x1c4] sm:$0xf] }
  0xe9   :  { %v2453_v57 = vor.u32 %v2739_v47, %v2450_v49  ;;  %v2370_v47 = vld [vmem:[#allocation7 + $0x228] sm:$0xf0]  ;;  %v2361_v49 = vor.u32 %v2720_v39, %v2360_v38  ;;  %v2762_v39 = vld [vmem:[#allocation7 + $0x414] sm:$0xf] }
  0xeb   :  { %1148 = vmatpush.bf16.msrb.mxu2 %v2265_v55  ;;  %1161 = vmatpush.bf16.msrb.mxu3 %v2269_v56  ;;  %v2736_v55 = vld [vmem:[#allocation7 + $0x51c] sm:$0xf0]  ;;  %v2449_v56 = vor.u32 %v2741_v46, %v2448_v43  ;;  %v2362_v43 = vld [vmem:[#allocation7 + $0x220] sm:$0xf0]  ;;  %v2719_v46 = vld [vmem:[#allocation7 + $0x1cc] sm:$0xf] }
  0xec   :  { %1174 = vmatpush.bf16.msra.mxu0 %v2273_v59  ;;  %1187 = vmatpush.bf16.msra.mxu1 %v2277_v60  ;;  %v2426_v59 = vld [vmem:[#allocation7 + $0x520] sm:$0xf0]  ;;  %v2432_v60 = vld [vmem:[#allocation7 + $0x4c8] sm:$0xf]  ;;  %v2425_v0 = vor.u32 %v2736_v55, %v2424_v54  ;;  %v2373_v54 = vor.u32 %v2719_v46, %v2370_v47  ;;  %v2520_v47 = vld [vmem:[#allocation7 + $0x350] sm:$0xf] }
  0xed   :  { %v2429_v1 = vor.u32 %v2734_v58, %v2426_v59  ;;  %v2714_v55 = vld [vmem:[#allocation7 + $0x104] sm:$0xf]  ;;  %v2717_v58 = vld [vmem:[#allocation7 + $0x164] sm:$0xf0]  ;;  %v2715_v59 = vld [vmem:[#allocation7 + $0x10c] sm:$0xf] }
  0xef   :  { %1149 = vmatpush.bf16.msrb.mxu2 %v2249_v3  ;;  %1162 = vmatpush.bf16.msrb.mxu3 %v2253_v4  ;;  %v2732_v3 = vld [vmem:[#allocation7 + $0x45c] sm:$0xf0]  ;;  %v2433_v4 = vor.u32 %v2737_v61, %v2432_v60  ;;  %v2354_v60 = vld [vmem:[#allocation7 + $0x168] sm:$0xf0] }
  0xf0   :  { %1175 = vmatpush.bf16.msra.mxu0 %v2257_v7  ;;  %1188 = vmatpush.bf16.msra.mxu1 %v2261_v8  ;;  %v2410_v7 = vld [vmem:[#allocation7 + $0x460] sm:$0xf0]  ;;  %v2416_v8 = vld [vmem:[#allocation7 + $0x408] sm:$0xf]  ;;  %v2409_v12 = vor.u32 %v2732_v3, %v2408_v2  ;;  %v2328_v61 = vld [vmem:[#allocation7 + $0x40] sm:$0xf] }
  0xf1   :  { %v2413_v13 = vor.u32 %v2730_v6, %v2410_v7  ;;  %v2330_v2 = vld [vmem:[#allocation7 + $0xa0] sm:$0xf0]  ;;  %v2713_v6 = vld [vmem:[#allocation7 + $0xa4] sm:$0xf0]  ;;  %v2711_v7 = vld [vmem:[#allocation7 + $0x4c] sm:$0xf] }
  0xf3   :  { %1150 = vmatpush.bf16.msrb.mxu2 %v2233_v15  ;;  %1163 = vmatpush.bf16.msrb.mxu3 %v2237_v16  ;;  %v2728_v15 = vld [vmem:[#allocation7 + $0x39c] sm:$0xf0]  ;;  %v2417_v16 = vor.u32 %v2733_v9, %v2416_v8  ;;  %v2338_v8 = vld [vmem:[#allocation7 + $0xa8] sm:$0xf0]  ;;  %v2568_v9 = vld [vmem:[#allocation7 + $0x590] sm:$0xf] }
  0xf4   :  { %1176 = vmatpush.bf16.msra.mxu0 %v2241_v19  ;;  %1189 = vmatpush.bf16.msra.mxu1 %v2245_v20  ;;  %v2394_v19 = vld [vmem:[#allocation7 + $0x3a0] sm:$0xf0]  ;;  %v2400_v20 = vld [vmem:[#allocation7 + $0x348] sm:$0xf]  ;;  %v2393_v24 = vor.u32 %v2728_v15, %v2392_v14 }
  0xf5   :  { %v2397_v25 = vor.u32 %v2726_v18, %v2394_v19  ;;  %v2578_v18 = vld [vmem:[#allocation7 + $0x5f8] sm:$0xf0] }
  0xf7   :  { %1151 = vmatpush.bf16.msrb.mxu2 %v2217_v28  ;;  %1164 = vmatpush.bf16.msrb.mxu3 %v2221_v29  ;;  %v2401_v28 = vor.u32 %v2729_v21, %v2400_v20  ;;  %v2405_v29 = vor.u32 %v2727_v22, %v2402_v23  ;;  %v2341_v20 = vor.u32 %v2711_v7, %v2338_v8  ;;  %v2552_v23 = vld [vmem:[#allocation7 + $0x4d0] sm:$0xf] }
  0xf8   :  { %1177 = vmatpush.bf16.msra.mxu0 %v2225_v33  ;;  %1190 = vmatpush.bf16.msra.mxu1 %v2229_v34  ;;  %v2725_v33 = vld [vmem:[#allocation7 + $0x2e4] sm:$0xf0]  ;;  %v2723_v34 = vld [vmem:[#allocation7 + $0x28c] sm:$0xf]  ;;  %v2569_v21 = vor.u32 %v2772_v10, %v2568_v9  ;;  %v2488_v8 = vld [vmem:[#allocation7 + $0x1d0] sm:$0xf] }
  0xf9   :  { %v2385_v40 = vor.u32 %v2725_v33, %v2384_v32  ;;  %v2389_v41 = vor.u32 %v2723_v34, %v2386_v35  ;;  %v2562_v32 = vld [vmem:[#allocation7 + $0x538] sm:$0xf0]  ;;  %v2536_v35 = vld [vmem:[#allocation7 + $0x410] sm:$0xf] }
  0xfa   :  { %v2565_v38 = vor.u32 %v2767_v31, %v2562_v32  ;;  %v2752_v9 = vld [vmem:[#allocation7 + $0x22c] sm:$0xf0] }
  0xfb   :  { %1152 = vmatpush.bf16.msrb.mxu2 %v2201_v44  ;;  %1165 = vmatpush.bf16.msrb.mxu3 %v2205_v45  ;;  %v2368_v44 = vld [vmem:[#allocation7 + $0x1c8] sm:$0xf]  ;;  %v2456_v32 = vld [vmem:[#allocation7 + $0x50] sm:$0xf] }
  0xfc   :  { %1178 = vmatpush.bf16.msra.mxu0 %v2209_v50  ;;  %1191 = vmatpush.bf16.msra.mxu1 %v2213_v51  ;;  %v2721_v45 = vld [vmem:[#allocation7 + $0x224] sm:$0xf0]  ;;  %v2365_v50 = vor.u32 %v2718_v42, %v2362_v43  ;;  %v2344_v51 = vld [vmem:[#allocation7 + $0x100] sm:$0xf]  ;;  %v2765_v42 = vld [vmem:[#allocation7 + $0x474] sm:$0xf0] }
  0xfd   :  { %v2763_v43 = vld [vmem:[#allocation7 + $0x41c] sm:$0xf] }
  0xfe   :  { %1153 = vmatmul.bf16.vlgmr.msrb.gmra.mxu2 %v3127_v48  ;;  %1166 = vmatmul.bf16.vlgmr.msrb.gmra.mxu3 %v3127_v48 }
  0xff   :  { %1403 = vmatpush.bf16.msra.mxu2 %v2441_v52  ;;  %1416 = vmatpush.bf16.msra.mxu3 %v2445_v53  ;;  %v2716_v52 = vld [vmem:[#allocation7 + $0x15c] sm:$0xf0]  ;;  %v2369_v53 = vor.u32 %v2721_v45, %v2368_v44  ;;  %v2546_v44 = vld [vmem:[#allocation7 + $0x478] sm:$0xf0] }
 0x100   :  { %1429 = vmatpush.bf16.msrb.mxu0 %v2449_v56  ;;  %1442 = vmatpush.bf16.msrb.mxu1 %v2453_v57  ;;  %v2346_v56 = vld [vmem:[#allocation7 + $0x160] sm:$0xf0]  ;;  %v2352_v57 = vld [vmem:[#allocation7 + $0x108] sm:$0xf]  ;;  %v2345_v62 = vor.u32 %v2716_v52, %v2344_v51  ;;  %v2549_v51 = vor.u32 %v2763_v43, %v2546_v44  ;;  %v2758_v52 = vld [vmem:[#allocation7 + $0x354] sm:$0xf] }
 0x101   :  { %1179 = vmatmul.bf16.vlgmr.msra.gmra.mxu0 %v3127_v48  ;;  %1192 = vmatmul.bf16.vlgmr.msra.gmra.mxu1 %v3127_v48  ;;  %v2349_v63 = vor.u32 %v2714_v55, %v2346_v56  ;;  %v2353_v3 = vor.u32 %v2717_v58, %v2352_v57  ;;  %v2761_v55 = vld [vmem:[#allocation7 + $0x3b4] sm:$0xf0]  ;;  %v2759_v56 = vld [vmem:[#allocation7 + $0x35c] sm:$0xf] }
 0x102   :  { %v2530_v57 = vld [vmem:[#allocation7 + $0x3b8] sm:$0xf0] }
 0x103   :  { %1404 = vmatpush.bf16.msra.mxu2 %v2425_v0  ;;  %1417 = vmatpush.bf16.msra.mxu3 %v2429_v1  ;;  %v2712_v0 = vld [vmem:[#allocation7 + $0x9c] sm:$0xf0]  ;;  %v2710_v1 = vld [vmem:[#allocation7 + $0x44] sm:$0xf] }
 0x104   :  { %1430 = vmatpush.bf16.msrb.mxu0 %v2433_v4  ;;  %1443 = vmatpush.bf16.msrb.mxu1 %v2437_v5  ;;  %v2357_v4 = vor.u32 %v2715_v59, %v2354_v60  ;;  %v2336_v5 = vld [vmem:[#allocation7 + $0x48] sm:$0xf]  ;;  %v2329_v14 = vor.u32 %v2712_v0, %v2328_v61  ;;  %v2333_v15 = vor.u32 %v2710_v1, %v2330_v2  ;;  %v2504_v60 = vld [vmem:[#allocation7 + $0x290] sm:$0xf]  ;;  %v2754_v0 = vld [vmem:[#allocation7 + $0x294] sm:$0xf] }
 0x105   :  { %v2337_v19 = vor.u32 %v2713_v6, %v2336_v5  ;;  %v2756_v61 = vld [vmem:[#allocation7 + $0x2ec] sm:$0xf0]  ;;  %v2506_v1 = vld [vmem:[#allocation7 + $0x2f0] sm:$0xf0]  ;;  %v2512_v2 = vld [vmem:[#allocation7 + $0x298] sm:$0xf] }
 0x106   :  { %v2514_v5 = vld [vmem:[#allocation7 + $0x2f8] sm:$0xf0]  ;;  %v2505_v6 = vor.u32 %v2756_v61, %v2504_v60  ;;  %v2509_v7 = vor.u32 %v2754_v0, %v2506_v1 }
 0x107   :  { %1405 = vmatpush.bf16.msra.mxu2 %v2409_v12  ;;  %1418 = vmatpush.bf16.msra.mxu3 %v2413_v13  ;;  %v2570_v12 = vld [vmem:[#allocation7 + $0x5f0] sm:$0xf0]  ;;  %v2576_v13 = vld [vmem:[#allocation7 + $0x598] sm:$0xf] }
 0x108   :  { %1431 = vmatpush.bf16.msrb.mxu0 %v2417_v16  ;;  %1444 = vmatpush.bf16.msrb.mxu1 %v2421_v17  ;;  %v2773_v16 = vld [vmem:[#allocation7 + $0x5f4] sm:$0xf0]  ;;  %v2771_v17 = vld [vmem:[#allocation7 + $0x59c] sm:$0xf]  ;;  %v2573_v22 = vor.u32 %v2770_v11, %v2570_v12  ;;  %v2750_v12 = vld [vmem:[#allocation7 + $0x1d4] sm:$0xf] }
 0x109   :  { %v2581_v26 = vor.u32 %v2771_v17, %v2578_v18  ;;  %v2498_v17 = vld [vmem:[#allocation7 + $0x238] sm:$0xf0]  ;;  %v2489_v18 = vor.u32 %v2752_v9, %v2488_v8 }
 0x10b   :  { %1406 = vmatpush.bf16.msra.mxu2 %v2393_v24  ;;  %1419 = vmatpush.bf16.msra.mxu3 %v2397_v25  ;;  %v2768_v24 = vld [vmem:[#allocation7 + $0x52c] sm:$0xf0]  ;;  %v2577_v25 = vor.u32 %v2773_v16, %v2576_v13  ;;  %v2490_v13 = vld [vmem:[#allocation7 + $0x230] sm:$0xf0]  ;;  %v2751_v16 = vld [vmem:[#allocation7 + $0x1dc] sm:$0xf] }
 0x10c   :  { %1432 = vmatpush.bf16.msrb.mxu0 %v2401_v28  ;;  %1445 = vmatpush.bf16.msrb.mxu1 %v2405_v29  ;;  %v2554_v28 = vld [vmem:[#allocation7 + $0x530] sm:$0xf0]  ;;  %v2560_v29 = vld [vmem:[#allocation7 + $0x4d8] sm:$0xf]  ;;  %v2553_v33 = vor.u32 %v2768_v24, %v2552_v23  ;;  %v2501_v23 = vor.u32 %v2751_v16, %v2498_v17 }
 0x10d   :  { %v2557_v34 = vor.u32 %v2766_v27, %v2554_v28  ;;  %v2746_v24 = vld [vmem:[#allocation7 + $0x114] sm:$0xf]  ;;  %v2749_v27 = vld [vmem:[#allocation7 + $0x174] sm:$0xf0]  ;;  %v2747_v28 = vld [vmem:[#allocation7 + $0x11c] sm:$0xf] }
 0x10f   :  { %1407 = vmatpush.bf16.msra.mxu2 %v2377_v36  ;;  %1420 = vmatpush.bf16.msra.mxu3 %v2381_v37  ;;  %v2764_v36 = vld [vmem:[#allocation7 + $0x46c] sm:$0xf0]  ;;  %v2561_v37 = vor.u32 %v2769_v30, %v2560_v29  ;;  %v2482_v29 = vld [vmem:[#allocation7 + $0x178] sm:$0xf0] }
 0x110   :  { %1433 = vmatpush.bf16.msrb.mxu0 %v2385_v40  ;;  %1446 = vmatpush.bf16.msrb.mxu1 %v2389_v41  ;;  %v2538_v40 = vld [vmem:[#allocation7 + $0x470] sm:$0xf0]  ;;  %v2544_v41 = vld [vmem:[#allocation7 + $0x418] sm:$0xf]  ;;  %v2537_v45 = vor.u32 %v2764_v36, %v2536_v35  ;;  %v2485_v35 = vor.u32 %v2747_v28, %v2482_v29 }
 0x111   :  { %v2541_v46 = vor.u32 %v2762_v39, %v2538_v40  ;;  %v2742_v36 = vld [vmem:[#allocation7 + $0x54] sm:$0xf]  ;;  %v2745_v39 = vld [vmem:[#allocation7 + $0xb4] sm:$0xf0]  ;;  %v2743_v40 = vld [vmem:[#allocation7 + $0x5c] sm:$0xf] }
 0x113   :  { %1408 = vmatpush.bf16.msra.mxu2 %v2361_v49  ;;  %1421 = vmatpush.bf16.msra.mxu3 %v2365_v50  ;;  %v2760_v49 = vld [vmem:[#allocation7 + $0x3ac] sm:$0xf0]  ;;  %v2545_v50 = vor.u32 %v2765_v42, %v2544_v41  ;;  %v2466_v41 = vld [vmem:[#allocation7 + $0xb8] sm:$0xf0] }
 0x114   :  { %1434 = vmatpush.bf16.msrb.mxu0 %v2369_v53  ;;  %1447 = vmatpush.bf16.msrb.mxu1 %v2373_v54  ;;  %v2522_v53 = vld [vmem:[#allocation7 + $0x3b0] sm:$0xf0]  ;;  %v2528_v54 = vld [vmem:[#allocation7 + $0x358] sm:$0xf]  ;;  %v2521_v58 = vor.u32 %v2760_v49, %v2520_v47 }
 0x115   :  { %v2525_v59 = vor.u32 %v2758_v52, %v2522_v53 }
 0x117   :  { %1409 = vmatpush.bf16.msra.mxu2 %v2345_v62  ;;  %1422 = vmatpush.bf16.msra.mxu3 %v2349_v63  ;;  %v2529_v62 = vor.u32 %v2761_v55, %v2528_v54  ;;  %v2533_v63 = vor.u32 %v2759_v56, %v2530_v57 }
 0x118   :  { %1435 = vmatpush.bf16.msrb.mxu0 %v2353_v3  ;;  %1448 = vmatpush.bf16.msrb.mxu1 %v2357_v4  ;;  %v2757_v3 = vld [vmem:[#allocation7 + $0x2f4] sm:$0xf0]  ;;  %v2755_v4 = vld [vmem:[#allocation7 + $0x29c] sm:$0xf] }
 0x119   :  { %v2513_v10 = vor.u32 %v2757_v3, %v2512_v2  ;;  %v2517_v11 = vor.u32 %v2755_v4, %v2514_v5 }
 0x11b   :  { %1410 = vmatpush.bf16.msra.mxu2 %v2329_v14  ;;  %1423 = vmatpush.bf16.msra.mxu3 %v2333_v15  ;;  %v2496_v14 = vld [vmem:[#allocation7 + $0x1d8] sm:$0xf] }
 0x11c   :  { %1436 = vmatpush.bf16.msrb.mxu0 %v2337_v19  ;;  %1449 = vmatpush.bf16.msrb.mxu1 %v2341_v20  ;;  %v2753_v15 = vld [vmem:[#allocation7 + $0x234] sm:$0xf0]  ;;  %v2493_v19 = vor.u32 %v2750_v12, %v2490_v13  ;;  %v2472_v20 = vld [vmem:[#allocation7 + $0x110] sm:$0xf] }
 0x11e   :  { %1411 = vmatmul.bf16.vlgmr.msra.gmra.mxu2 %v3127_v48  ;;  %1424 = vmatmul.bf16.vlgmr.msra.gmra.mxu3 %v3127_v48 }
 0x11f   :  { %1661 = vmatpush.bf16.msrb.mxu2 %v2569_v21  ;;  %1674 = vmatpush.bf16.msrb.mxu3 %v2573_v22  ;;  %v2748_v21 = vld [vmem:[#allocation7 + $0x16c] sm:$0xf0]  ;;  %v2497_v22 = vor.u32 %v2753_v15, %v2496_v14  ;;  %v717_v14 = vld [vmem:[#allocation8 + $0x8] sm:$0xf] }
 0x120   :  { %1687 = vmatpush.bf16.msra.mxu0 %v2577_v25  ;;  %1700 = vmatpush.bf16.msra.mxu1 %v2581_v26  ;;  %v2474_v25 = vld [vmem:[#allocation7 + $0x170] sm:$0xf0]  ;;  %v2480_v26 = vld [vmem:[#allocation7 + $0x118] sm:$0xf]  ;;  %v2473_v30 = vor.u32 %v2748_v21, %v2472_v20  ;;  %v721_v17 = vperm.slane %v717_v14, 2 }
 0x121   :  { %1437 = vmatmul.bf16.vlgmr.msrb.gmra.mxu0 %v3127_v48  ;;  %1450 = vmatmul.bf16.vlgmr.msrb.gmra.mxu1 %v3127_v48  ;;  %v2477_v31 = vor.u32 %v2746_v24, %v2474_v25  ;;  %v720_v24 = vperm.slane %v717_v14, 1 }
 0x123   :  { %1662 = vmatpush.bf16.msrb.mxu2 %v2553_v33  ;;  %1675 = vmatpush.bf16.msrb.mxu3 %v2557_v34  ;;  %v2744_v33 = vld [vmem:[#allocation7 + $0xac] sm:$0xf0]  ;;  %v2481_v34 = vor.u32 %v2749_v27, %v2480_v26 }
 0x124   :  { %1688 = vmatpush.bf16.msra.mxu0 %v2561_v37  ;;  %1701 = vmatpush.bf16.msra.mxu1 %v2565_v38  ;;  %v2458_v37 = vld [vmem:[#allocation7 + $0xb0] sm:$0xf0]  ;;  %v2464_v38 = vld [vmem:[#allocation7 + $0x58] sm:$0xf]  ;;  %v2457_v42 = vor.u32 %v2744_v33, %v2456_v32  ;;  %v975_v33 = vld [vmem:[#allocation8 + $0xc] sm:$0xf] }
 0x125   :  { %v2461_v43 = vor.u32 %v2742_v36, %v2458_v37  ;;  %v2465_v44 = vor.u32 %v2745_v39, %v2464_v38 }
 0x127   :  { %1663 = vmatpush.bf16.msrb.mxu2 %v2537_v45  ;;  %1676 = vmatpush.bf16.msrb.mxu3 %v2541_v46  ;;  %v2469_v45 = vor.u32 %v2743_v40, %v2466_v41  ;;  %v201_v46 = vld [vmem:[#allocation8] sm:$0xf]  ;;  %v977_v40 = vperm.slane %v975_v33, 0  ;;  %v978_v41 = vperm.slane %v975_v33, 1 }
 0x128   :  { %1689 = vmatpush.bf16.msra.mxu0 %v2545_v50  ;;  %1702 = vmatpush.bf16.msra.mxu1 %v2549_v51  ;;  %v205_v47 = vperm.slane %v201_v46, 2  ;;  %v206_v49 = vperm.slane %v201_v46, 3  ;;  %v203_v54 = vperm.slane %v201_v46, 0  ;;  %v204_v55 = vperm.slane %v201_v46, 1 }
 0x12b   :  { %1664 = vmatpush.bf16.msrb.mxu2 %v2521_v58  ;;  %1677 = vmatpush.bf16.msrb.mxu3 %v2525_v59 }
 0x12c   :  { %1690 = vmatpush.bf16.msra.mxu0 %v2529_v62  ;;  %1703 = vmatpush.bf16.msra.mxu1 %v2533_v63 }
 0x12f   :  { %1665 = vmatpush.bf16.msrb.mxu2 %v2505_v6  ;;  %1678 = vmatpush.bf16.msrb.mxu3 %v2509_v7 }
 0x130   :  { %1691 = vmatpush.bf16.msra.mxu0 %v2513_v10  ;;  %1704 = vmatpush.bf16.msra.mxu1 %v2517_v11 }
 0x133   :  { %1666 = vmatpush.bf16.msrb.mxu2 %v2489_v18  ;;  %1679 = vmatpush.bf16.msrb.mxu3 %v2493_v19  ;;  %v722_v18 = vperm.slane %v717_v14, 3 }
 0x134   :  { %1692 = vmatpush.bf16.msra.mxu0 %v2497_v22  ;;  %1705 = vmatpush.bf16.msra.mxu1 %v2501_v23  ;;  %v719_v23 = vperm.slane %v717_v14, 0 }
 0x137   :  { %1667 = vmatpush.bf16.msrb.mxu2 %v2473_v30  ;;  %1680 = vmatpush.bf16.msrb.mxu3 %v2477_v31 }
 0x138   :  { %1693 = vmatpush.bf16.msra.mxu0 %v2481_v34  ;;  %1706 = vmatpush.bf16.msra.mxu1 %v2485_v35  ;;  %v979_v34 = vperm.slane %v975_v33, 2  ;;  %v980_v35 = vperm.slane %v975_v33, 3 }
 0x13b   :  { %1668 = vmatpush.bf16.msrb.mxu2 %v2457_v42  ;;  %1681 = vmatpush.bf16.msrb.mxu3 %v2461_v43  ;;  %v406_v50 = vpop.f32.mrf.mxu0  ;;  %v419_v51 = vpop.f32.mrf.mxu1 }
 0x13c   :  { %1694 = vmatpush.bf16.msra.mxu0 %v2465_v44  ;;  %1707 = vmatpush.bf16.msra.mxu1 %v2469_v45  ;;  %v407_v52 = vadd.f32 %v406_v50, %v205_v47  ;;  %v420_v53 = vadd.f32 %v419_v51, %v206_v49  ;;  %v1233_v51 = vld [vmem:[#allocation8 + $0x10] sm:$0xf] }
 0x13e   :  { %1669 = vmatmul.bf16.vlgmr.msrb.gmra.mxu2 %v3127_v48  ;;  %1682 = vmatmul.bf16.vlgmr.msrb.gmra.mxu3 %v3127_v48  ;;  %425 = vst [vmem:[#allocation10 + $0x10] sm:$0xff] %v407_v52  ;;  %v1237_v52 = vperm.slane %v1233_v51, 2 }
 0x13f   :  { %1695 = vmatmul.bf16.vlgmr.msra.gmra.mxu0 %v3127_v48  ;;  %1708 = vmatmul.bf16.vlgmr.msra.gmra.mxu1 %v3127_v48  ;;  %426 = vst [vmem:[#allocation10 + $0x18] sm:$0xff] %v420_v53  ;;  %v459_v48 = vld [vmem:[#allocation8 + $0x4] sm:$0xf]  ;;  %v1238_v53 = vperm.slane %v1233_v51, 3 }
 0x140   :  { %v380_v56 = vpop.f32.mrf.mxu2  ;;  %v393_v57 = vpop.f32.mrf.mxu3  ;;  %v463_v0 = vperm.slane %v459_v48, 2  ;;  %v464_v1 = vperm.slane %v459_v48, 3  ;;  %v461_v6 = vperm.slane %v459_v48, 0  ;;  %v462_v7 = vperm.slane %v459_v48, 1 }
 0x141   :  { %v381_v58 = vadd.f32 %v380_v56, %v203_v54  ;;  %v394_v59 = vadd.f32 %v393_v57, %v204_v55 }
 0x143   :  { %423 = vst [vmem:[#allocation10] sm:$0xff] %v381_v58  ;;  %v408_v60 = vpop.f32.mrf.mxu0  ;;  %v421_v61 = vpop.f32.mrf.mxu1  ;;  %v1235_v58 = vperm.slane %v1233_v51, 0 }
 0x144   :  { %424 = vst [vmem:[#allocation10 + $0x8] sm:$0xff] %v394_v59  ;;  %v1236_v59 = vperm.slane %v1233_v51, 1 }
 0x145   :  { %1727 = dma.vmem_to_hbm [thread:$0]  %s1723_s18, 512, %s1725_s16, [#allocation4]  }
 0x148   :  { %v382_v62 = vpop.f32.mrf.mxu2  ;;  %v395_v63 = vpop.f32.mrf.mxu3 }
 0x14b   :  { %v664_v2 = vpop.f32.mrf.mxu0  ;;  %v677_v3 = vpop.f32.mrf.mxu1 }
 0x14c   :  { %v665_v4 = vadd.f32 %v664_v2, %v463_v0  ;;  %v678_v5 = vadd.f32 %v677_v3, %v464_v1  ;;  %v1491_v3 = vld [vmem:[#allocation8 + $0x14] sm:$0xf] }
 0x14e   :  { %683 = vst [vmem:[#allocation11 + $0x10] sm:$0xff] %v665_v4  ;;  %v1495_v4 = vperm.slane %v1491_v3, 2 }
 0x14f   :  { %684 = vst [vmem:[#allocation11 + $0x18] sm:$0xff] %v678_v5  ;;  %v1496_v5 = vperm.slane %v1491_v3, 3 }
 0x150   :  { %v638_v8 = vpop.f32.mrf.mxu2  ;;  %v651_v9 = vpop.f32.mrf.mxu3 }
 0x151   :  { %v639_v10 = vadd.f32 %v638_v8, %v461_v6  ;;  %v652_v11 = vadd.f32 %v651_v9, %v462_v7 }
 0x153   :  { %681 = vst [vmem:[#allocation11] sm:$0xff] %v639_v10  ;;  %v666_v12 = vpop.f32.mrf.mxu0  ;;  %v679_v13 = vpop.f32.mrf.mxu1  ;;  %v1493_v10 = vperm.slane %v1491_v3, 0 }
 0x154   :  { %682 = vst [vmem:[#allocation11 + $0x8] sm:$0xff] %v652_v11  ;;  %v1494_v11 = vperm.slane %v1491_v3, 1 }
 0x155   :  { %1738 = dma.vmem_to_hbm [thread:$0]  %s1734_s5, 512, %s1736_s22, [#allocation12]  }
 0x158   :  { %v640_v15 = vpop.f32.mrf.mxu2  ;;  %v653_v16 = vpop.f32.mrf.mxu3 }
 0x15e   :  { %v922_v19 = vpop.f32.mrf.mxu0  ;;  %v935_v20 = vpop.f32.mrf.mxu1 }
 0x15f   :  { %v923_v21 = vadd.f32 %v922_v19, %v721_v17  ;;  %v936_v22 = vadd.f32 %v935_v20, %v722_v18 }
 0x161   :  { %941 = vst [vmem:[#allocation13 + $0x10] sm:$0xff] %v923_v21  ;;  %v896_v25 = vpop.f32.mrf.mxu2  ;;  %v909_v26 = vpop.f32.mrf.mxu3 }
 0x162   :  { %942 = vst [vmem:[#allocation13 + $0x18] sm:$0xff] %v936_v22  ;;  %v897_v27 = vadd.f32 %v896_v25, %v719_v23  ;;  %v910_v28 = vadd.f32 %v909_v26, %v720_v24 }
 0x164   :  { %939 = vst [vmem:[#allocation13] sm:$0xff] %v897_v27 }
 0x165   :  { %940 = vst [vmem:[#allocation13 + $0x8] sm:$0xff] %v910_v28 }
 0x166   :  { %v924_v29 = vpop.f32.mrf.mxu0  ;;  %v937_v30 = vpop.f32.mrf.mxu1  ;;  %1749 = dma.vmem_to_hbm [thread:$0]  %s1745_s23, 512, %s1747_s26, [#allocation12]  }
 0x169   :  { %v898_v31 = vpop.f32.mrf.mxu2  ;;  %v911_v32 = vpop.f32.mrf.mxu3 }
 0x17e   :  { %v1180_v36 = vpop.f32.mrf.mxu0  ;;  %v1193_v37 = vpop.f32.mrf.mxu1 }
 0x17f   :  { %v1181_v38 = vadd.f32 %v1180_v36, %v979_v34  ;;  %v1194_v39 = vadd.f32 %v1193_v37, %v980_v35 }
 0x181   :  { %1199 = vst [vmem:[#allocation14 + $0x10] sm:$0xff] %v1181_v38  ;;  %v1154_v42 = vpop.f32.mrf.mxu2  ;;  %v1167_v43 = vpop.f32.mrf.mxu3 }
 0x182   :  { %1200 = vst [vmem:[#allocation14 + $0x18] sm:$0xff] %v1194_v39  ;;  %v1155_v44 = vadd.f32 %v1154_v42, %v977_v40  ;;  %v1168_v45 = vadd.f32 %v1167_v43, %v978_v41 }
 0x184   :  { %1197 = vst [vmem:[#allocation14] sm:$0xff] %v1155_v44 }
 0x185   :  { %1198 = vst [vmem:[#allocation14 + $0x8] sm:$0xff] %v1168_v45 }
 0x186   :  { %v1182_v46 = vpop.f32.mrf.mxu0  ;;  %v1195_v47 = vpop.f32.mrf.mxu1  ;;  %1760 = dma.vmem_to_hbm [thread:$0]  %s1756_s27, 512, %s1758_s29, [#allocation15]  }
 0x189   :  { %v1156_v49 = vpop.f32.mrf.mxu2  ;;  %v1169_v50 = vpop.f32.mrf.mxu3 }
 0x19e   :  { %v1438_v54 = vpop.f32.mrf.mxu0  ;;  %v1451_v55 = vpop.f32.mrf.mxu1 }
 0x19f   :  { %v1439_v56 = vadd.f32 %v1438_v54, %v1237_v52  ;;  %v1452_v57 = vadd.f32 %v1451_v55, %v1238_v53 }
 0x1a1   :  { %1457 = vst [vmem:[#allocation16 + $0x10] sm:$0xff] %v1439_v56  ;;  %v1412_v60 = vpop.f32.mrf.mxu2  ;;  %v1425_v61 = vpop.f32.mrf.mxu3 }
 0x1a2   :  { %1458 = vst [vmem:[#allocation16 + $0x18] sm:$0xff] %v1452_v57  ;;  %v1413_v48 = vadd.f32 %v1412_v60, %v1235_v58  ;;  %v1426_v62 = vadd.f32 %v1425_v61, %v1236_v59 }
 0x1a4   :  { %1455 = vst [vmem:[#allocation16] sm:$0xff] %v1413_v48 }
 0x1a5   :  { %1456 = vst [vmem:[#allocation16 + $0x8] sm:$0xff] %v1426_v62 }
 0x1a6   :  { %v1440_v63 = vpop.f32.mrf.mxu0  ;;  %v1453_v0 = vpop.f32.mrf.mxu1  ;;  %1771 = dma.vmem_to_hbm [thread:$0]  %s1767_s30, 512, %s1769_s12, [#allocation15]  }
 0x1a9   :  { %v1414_v1 = vpop.f32.mrf.mxu2  ;;  %v1427_v2 = vpop.f32.mrf.mxu3 }
 0x1bc   :  { %v1696_v6 = vpop.f32.mrf.mxu0  ;;  %v1709_v7 = vpop.f32.mrf.mxu1 }
 0x1bd   :  { %v1697_v8 = vadd.f32 %v1696_v6, %v1495_v4  ;;  %v1710_v9 = vadd.f32 %v1709_v7, %v1496_v5 }
 0x1bf   :  { %1715 = vst [vmem:[#allocation17 + $0x10] sm:$0xff] %v1697_v8 }
 0x1c0   :  { %1716 = vst [vmem:[#allocation17 + $0x18] sm:$0xff] %v1710_v9 }
 0x1c1   :  { %v1670_v12 = vpop.f32.mrf.mxu2  ;;  %v1683_v13 = vpop.f32.mrf.mxu3 }
 0x1c2   :  { %v1671_v14 = vadd.f32 %v1670_v12, %v1493_v10  ;;  %v1684_v15 = vadd.f32 %v1683_v13, %v1494_v11 }
 0x1c4   :  { %1713 = vst [vmem:[#allocation17] sm:$0xff] %v1671_v14  ;;  %v1698_v16 = vpop.f32.mrf.mxu0  ;;  %v1711_v17 = vpop.f32.mrf.mxu1 }
 0x1c5   :  { %1714 = vst [vmem:[#allocation17 + $0x8] sm:$0xff] %v1684_v15 }
 0x1c6   :  { %1782 = dma.vmem_to_hbm [thread:$0]  %s1778_s13, 512, %s1780_s4, [#allocation18]  }
 0x1c9   :  { %v1672_v18 = vpop.f32.mrf.mxu2  ;;  %v1685_v19 = vpop.f32.mrf.mxu3 }
 0x1ca   :  { %3035 = dma.done.wait [#allocation4], 512  }
 0x1cb   :  { %3036 = vsyncadd [#allocation4], 4294966784 }
 0x1cc   :  { %3037 = dma.done.wait [#allocation12], 1024  }
 0x1cd   :  { %3038 = vsyncadd [#allocation12], 4294966272 }
 0x1ce   :  { %3039 = dma.done.wait [#allocation15], 1024  }
 0x1cf   :  { %3040 = vsyncadd [#allocation15], 4294966272 }
 0x1d0   :  { %3041 = dma.done.wait [#allocation18], 512  }
 0x1d1   :  { %3042 = vsyncadd [#allocation18], 4294966784 }
 0x1d2   :  { %1807 = vsyncpa [#allocation3], 1 }
 0x1d3   :  { %1808 = vsyncpa [#allocation6], 1 }
 0x1d4   :  { %1809 = vsyncpa [#allocation9], 1 }
 0x1d5   :  { %1810 = vsyncpa [#allocation4], 1 }
 0x1d6   :  { %1811 = vsyncpa [#allocation12], 1 }
 0x1d7   :  { %1812 = vsyncpa [#allocation15], 1 }
 0x1d8   :  { %1813 = vsyncpa [#allocation18], 1 }

</bundles_post_ra>
